<compile_context>
chip_gen: v7x
topology: tpu7x:2x2x1
jax: 0.10.0
libtpu: 0.0.40
codegen_flags: <defaults>
</compile_context>

<pallas_src>
import functools

import jax
import jax.numpy as jnp
from jax.experimental import pallas as pl
from jax.experimental.pallas import tpu as pltpu


def _ofpn_fused_kernel(x_ref, w1_ref, b1_ref, w2_ref, b2_ref, w3_ref, b3_ref,
                       mask_ref, o_ref, patch_ref, bufa_ref, bufb_ref,
                       *, Wp, H_out, kern, pad):
    # x_ref    : (1, C_in, Ltot)   zero-padded flat input plane (one batch elem)
    # wX_ref   : (CoutX, K*K*CinX) im2col-ordered weights (tap-major, ch-minor)
    # bX_ref   : (CoutX, 1)        bias column
    # mask_ref : (1, M)            1.0 on real columns, 0.0 on pad columns
    # o_ref    : (1, C3, M)        extended output plane (garbage cols kept)
    # patch_ref: (K*K*Cmax, M)     im2col scratch, shared across layers
    # bufa/bufb: (C1/C2, Ltot)     padded planes for the intermediate layers
    M = H_out * Wp                 # extended spatial plane size
    OFF = pad * Wp + pad           # flat offset of the valid region in a plane
    taps = [kh * Wp + kw for kh in range(kern) for kw in range(kern)]

    def conv_layer(plane, cin, w_ref, b_ref):
        # plane: (cin, Ltot) value holding a zero-padded activation plane.
        # Build the im2col matrix: row t*cin + ci is tap t of channel ci.
        for t, off in enumerate(taps):
            patch_ref[pl.ds(t * cin, cin), :] = plane[:, off:off + M]
        kkc = kern * kern * cin
        acc = jnp.dot(w_ref[...], patch_ref[pl.ds(0, kkc), :],
                      preferred_element_type=jnp.float32)
        return acc + b_ref[...]    # (cout, M); bias broadcast over lanes

    def stash(acc, buf_ref):
        # Zero the plane, then drop the masked activation at offset OFF: the
        # zeroed pad columns wrap into exactly the left/right zero padding the
        # next layer's convolution needs.
        buf_ref[...] = jnp.zeros_like(buf_ref)
        buf_ref[:, pl.ds(OFF, M)] = (acc * mask_ref[...]).astype(buf_ref.dtype)

    c_in = x_ref.shape[1]
    c1 = bufa_ref.shape[0]
    c2 = bufb_ref.shape[0]

    a1 = conv_layer(x_ref[0], c_in, w1_ref, b1_ref)
    stash(a1, bufa_ref)
    a2 = conv_layer(bufa_ref[...], c1, w2_ref, b2_ref)
    stash(a2, bufb_ref)
    a3 = conv_layer(bufb_ref[...], c2, w3_ref, b3_ref)
    o_ref[0] = a3.astype(o_ref.dtype)      # lane-dense (C3, H*Wp) store


def ofpn_pallas_forward(x_nchw, kernel_params, *, kern, stride, padding):
    """Fused 3-layer conv forward. Input/output are NCHW (PyTorch layout)."""
    assert stride == 1 and kern == 2 * padding + 1, (
        "fused OFPN kernel currently supports stride=1 'same' convolutions")
    # TODO(synk): general stride / non-'same' kern-padding combos need
    # per-layer plane geometry (spatial size changes between layers).

    N, C_in, H, W = x_nchw.shape
    p = padding
    Hp, Wp = H + 2 * p, W + 2 * p
    Ltot = (Hp + 1) * Wp          # one extra zero row absorbs tap read overrun
    M = H * Wp                    # extended output plane (pad columns kept)

    (w1, b1), (w2, b2), (w3, b3) = kernel_params
    c1, c2, c3 = w1.shape[0], w2.shape[0], w3.shape[0]
    kkc_max = kern * kern * max(C_in, c1, c2)

    # One pad + reshape for the whole fused forward (extra bottom row = tail).
    x_ext = jnp.pad(x_nchw, ((0, 0), (0, 0), (p, p + 1), (p, p)))
    x_ext = x_ext.reshape(N, C_in, Ltot)

    # 1.0 on real columns (col-in-row < W), 0.0 on the 2*pad garbage columns.
    mask = (jnp.arange(M) % Wp < W).astype(x_nchw.dtype).reshape(1, M)

    kernel = functools.partial(_ofpn_fused_kernel,
                               Wp=Wp, H_out=H, kern=kern, pad=p)

    out_ext = pl.pallas_call(
        kernel,
        out_shape=jax.ShapeDtypeStruct((N, c3, M), x_nchw.dtype),
        grid_spec=pltpu.PrefetchScalarGridSpec(
            num_scalar_prefetch=0,
            grid=(N,),
            in_specs=[
                pl.BlockSpec((1, C_in, Ltot), lambda n: (n, 0, 0)),
                pl.BlockSpec(w1.shape, lambda n: (0, 0)),
                pl.BlockSpec((c1, 1), lambda n: (0, 0)),
                pl.BlockSpec(w2.shape, lambda n: (0, 0)),
                pl.BlockSpec((c2, 1), lambda n: (0, 0)),
                pl.BlockSpec(w3.shape, lambda n: (0, 0)),
                pl.BlockSpec((c3, 1), lambda n: (0, 0)),
                pl.BlockSpec((1, M), lambda n: (0, 0)),
            ],
            out_specs=pl.BlockSpec((1, c3, M), lambda n: (n, 0, 0)),
            scratch_shapes=[
                pltpu.VMEM((kkc_max, M), jnp.float32),   # shared im2col buffer
                pltpu.VMEM((c1, Ltot), jnp.float32),     # layer-1 output plane
                pltpu.VMEM((c2, Ltot), jnp.float32),     # layer-2 output plane
            ],
        ),
        compiler_params=pltpu.CompilerParams(
            dimension_semantics=("parallel",)),
    )(x_ext, w1, b1, w2, b2, w3, b3, mask)

    # Strip the garbage (pad) columns and restore NCHW.
    return out_ext.reshape(N, c3, H, Wp)[:, :, :, :W]


class OFPNPallas:
    """Mirrors OFPN: Conv(C_in -> C_out//4) -> Conv(-> C_out//2) -> Conv(-> C_in),
    all with the same (kern, stride, padding), no activation / norm."""

    def __init__(self, C_in, C_out, stride, kern, padding, key):
        self.stride, self.kern, self.padding = stride, kern, padding
        chans = [C_in, C_out // 4, C_out // 2, C_in]
        self.ref_params = []      # PyTorch-style (OIHW weight, bias vector)
        self.kernel_params = []   # im2col weight matrix, bias column
        for i in range(3):
            cin, cout = chans[i], chans[i + 1]
            key, kw_, kb_ = jax.random.split(key, 3)
            fan_in = cin * kern * kern
            bound = 1.0 / (fan_in ** 0.5)
            w_oihw = jax.random.uniform(kw_, (cout, cin, kern, kern),
                                        jnp.float32, -bound, bound)
            b = jax.random.uniform(kb_, (cout,), jnp.float32, -bound, bound)
            self.ref_params.append((w_oihw, b))
            # (Cout, Cin, KH, KW) -> (Cout, KH, KW, Cin) -> (Cout, K*K*Cin);
            # row order matches the tap-major / channel-minor im2col rows.
            w_mat = jnp.transpose(w_oihw, (0, 2, 3, 1)).reshape(
                cout, kern * kern * cin)
            self.kernel_params.append((w_mat, b.reshape(cout, 1)))

    def __call__(self, x_nchw):
        return ofpn_pallas_forward(x_nchw, self.kernel_params,
                                   kern=self.kern, stride=self.stride,
                                   padding=self.padding)


def _reference(x_nchw, model):
    """Pure-JAX reference (lax.conv) for a numerical sanity check."""
    y = x_nchw
    for w_oihw, b in model.ref_params:
        y = jax.lax.conv_general_dilated(
            y, w_oihw,
            window_strides=(model.stride, model.stride),
            padding=[(model.padding, model.padding)] * 2,
            dimension_numbers=("NCHW", "OIHW", "NCHW"),
        ) + b[None, :, None, None]
    return y


if __name__ == "__main__":
    key = jax.random.PRNGKey(0)
    k_x, k_p = jax.random.split(key)

    # Small shapes consistent with the module: batch=2, C_in=4, C_out=8,
    # spatial 16x16, kern=3, stride=1, padding=1.
    N, C_in, C_out, H, W = 2, 4, 8, 16, 16
    kern, stride, padding = 3, 1, 1

    x = jax.random.normal(k_x, (N, C_in, H, W), jnp.float32)
    model = OFPNPallas(C_in, C_out, stride, kern, padding, k_p)

    out = jax.block_until_ready(model(x))

    ref = _reference(x, model)
    assert out.shape == ref.shape == (N, C_in, H, W)
    assert jnp.allclose(out, ref, atol=1e-4, rtol=1e-4), "mismatch vs reference"

    print("KERNEL_OK")
</pallas_src>

<mosaic_0001>
module attributes {stable_mosaic.version = 11 : i64} {
  func.func @_ofpn_fused_kernel(%arg0: i32, %arg1: memref<1x4x342xf32, #tpu.memory_space<vmem>>, %arg2: memref<2x36xf32, #tpu.memory_space<vmem>>, %arg3: memref<2x1xf32, #tpu.memory_space<vmem>>, %arg4: memref<4x18xf32, #tpu.memory_space<vmem>>, %arg5: memref<4x1xf32, #tpu.memory_space<vmem>>, %arg6: memref<4x36xf32, #tpu.memory_space<vmem>>, %arg7: memref<4x1xf32, #tpu.memory_space<vmem>>, %arg8: memref<1x288xf32, #tpu.memory_space<vmem>>, %arg9: memref<1x4x288xf32, #tpu.memory_space<vmem>>, %arg10: memref<36x288xf32, #tpu.memory_space<vmem>>, %arg11: memref<2x342xf32, #tpu.memory_space<vmem>>, %arg12: memref<4x342xf32, #tpu.memory_space<vmem>>) attributes {dimension_semantics = [#tpu.dimension_semantics<parallel>], iteration_bounds = array<i64: 2>, scalar_prefetch = 0 : i64, scratch_operands = 3 : i64, tpu.core_type = #tpu.core_type<tc>, window_params = [{transform_indices = @transform_0, window_bounds = array<i64: 1, 4, 342>}, {pipeline_mode = #tpu.pipeline_mode<synchronous>, transform_indices = @transform_1, window_bounds = array<i64: 2, 36>}, {pipeline_mode = #tpu.pipeline_mode<synchronous>, transform_indices = @transform_2, window_bounds = array<i64: 2, 1>}, {pipeline_mode = #tpu.pipeline_mode<synchronous>, transform_indices = @transform_3, window_bounds = array<i64: 4, 18>}, {pipeline_mode = #tpu.pipeline_mode<synchronous>, transform_indices = @transform_4, window_bounds = array<i64: 4, 1>}, {pipeline_mode = #tpu.pipeline_mode<synchronous>, transform_indices = @transform_5, window_bounds = array<i64: 4, 36>}, {pipeline_mode = #tpu.pipeline_mode<synchronous>, transform_indices = @transform_6, window_bounds = array<i64: 4, 1>}, {pipeline_mode = #tpu.pipeline_mode<synchronous>, transform_indices = @transform_7, window_bounds = array<i64: 1, 288>}, {transform_indices = @transform_8, window_bounds = array<i64: 1, 4, 288>}]} {
    %c0 = arith.constant 0 : index
    %c0_0 = arith.constant 0 : index
    %c0_1 = arith.constant 0 : index
    %0 = vector.load %arg1[%c0, %c0_0, %c0_1] : memref<1x4x342xf32, #tpu.memory_space<vmem>>, vector<1x4x342xf32>
    %1 = vector.shape_cast %0 : vector<1x4x342xf32> to vector<4x342xf32>
    %2 = vector.extract_strided_slice %1 {offsets = [0, 0], sizes = [4, 288], strides = [1, 1]} : vector<4x342xf32> to vector<4x288xf32>
    %c0_2 = arith.constant 0 : index
    %c0_3 = arith.constant 0 : index
    %3 = vector.load %arg10[%c0_2, %c0_3] : memref<36x288xf32, #tpu.memory_space<vmem>>, vector<4x288xf32>
    tpu.vector_store %arg10[%c0_2, %c0_3], %2 {strides = array<i32>} : memref<36x288xf32, #tpu.memory_space<vmem>>, vector<4x288xf32>,
    %4 = vector.extract_strided_slice %1 {offsets = [0, 1], sizes = [4, 288], strides = [1, 1]} : vector<4x342xf32> to vector<4x288xf32>
    %c4 = arith.constant 4 : index
    %c0_4 = arith.constant 0 : index
    %5 = vector.load %arg10[%c4, %c0_4] : memref<36x288xf32, #tpu.memory_space<vmem>>, vector<4x288xf32>
    tpu.vector_store %arg10[%c4, %c0_4], %4 {strides = array<i32>} : memref<36x288xf32, #tpu.memory_space<vmem>>, vector<4x288xf32>,
    %6 = vector.extract_strided_slice %1 {offsets = [0, 2], sizes = [4, 288], strides = [1, 1]} : vector<4x342xf32> to vector<4x288xf32>
    %c8 = arith.constant 8 : index
    %c0_5 = arith.constant 0 : index
    %7 = vector.load %arg10[%c8, %c0_5] : memref<36x288xf32, #tpu.memory_space<vmem>>, vector<4x288xf32>
    tpu.vector_store %arg10[%c8, %c0_5], %6 {strides = array<i32>} : memref<36x288xf32, #tpu.memory_space<vmem>>, vector<4x288xf32>,
    %8 = vector.extract_strided_slice %1 {offsets = [0, 18], sizes = [4, 288], strides = [1, 1]} : vector<4x342xf32> to vector<4x288xf32>
    %c12 = arith.constant 12 : index
    %c0_6 = arith.constant 0 : index
    %9 = vector.load %arg10[%c12, %c0_6] : memref<36x288xf32, #tpu.memory_space<vmem>>, vector<4x288xf32>
    tpu.vector_store %arg10[%c12, %c0_6], %8 {strides = array<i32>} : memref<36x288xf32, #tpu.memory_space<vmem>>, vector<4x288xf32>,
    %10 = vector.extract_strided_slice %1 {offsets = [0, 19], sizes = [4, 288], strides = [1, 1]} : vector<4x342xf32> to vector<4x288xf32>
    %c16 = arith.constant 16 : index
    %c0_7 = arith.constant 0 : index
    %11 = vector.load %arg10[%c16, %c0_7] : memref<36x288xf32, #tpu.memory_space<vmem>>, vector<4x288xf32>
    tpu.vector_store %arg10[%c16, %c0_7], %10 {strides = array<i32>} : memref<36x288xf32, #tpu.memory_space<vmem>>, vector<4x288xf32>,
    %12 = vector.extract_strided_slice %1 {offsets = [0, 20], sizes = [4, 288], strides = [1, 1]} : vector<4x342xf32> to vector<4x288xf32>
    %c20 = arith.constant 20 : index
    %c0_8 = arith.constant 0 : index
    %13 = vector.load %arg10[%c20, %c0_8] : memref<36x288xf32, #tpu.memory_space<vmem>>, vector<4x288xf32>
    tpu.vector_store %arg10[%c20, %c0_8], %12 {strides = array<i32>} : memref<36x288xf32, #tpu.memory_space<vmem>>, vector<4x288xf32>,
    %14 = vector.extract_strided_slice %1 {offsets = [0, 36], sizes = [4, 288], strides = [1, 1]} : vector<4x342xf32> to vector<4x288xf32>
    %c24 = arith.constant 24 : index
    %c0_9 = arith.constant 0 : index
    %15 = vector.load %arg10[%c24, %c0_9] : memref<36x288xf32, #tpu.memory_space<vmem>>, vector<4x288xf32>
    tpu.vector_store %arg10[%c24, %c0_9], %14 {strides = array<i32>} : memref<36x288xf32, #tpu.memory_space<vmem>>, vector<4x288xf32>,
    %16 = vector.extract_strided_slice %1 {offsets = [0, 37], sizes = [4, 288], strides = [1, 1]} : vector<4x342xf32> to vector<4x288xf32>
    %c28 = arith.constant 28 : index
    %c0_10 = arith.constant 0 : index
    %17 = vector.load %arg10[%c28, %c0_10] : memref<36x288xf32, #tpu.memory_space<vmem>>, vector<4x288xf32>
    tpu.vector_store %arg10[%c28, %c0_10], %16 {strides = array<i32>} : memref<36x288xf32, #tpu.memory_space<vmem>>, vector<4x288xf32>,
    %18 = vector.extract_strided_slice %1 {offsets = [0, 38], sizes = [4, 288], strides = [1, 1]} : vector<4x342xf32> to vector<4x288xf32>
    %c32 = arith.constant 32 : index
    %c0_11 = arith.constant 0 : index
    %19 = vector.load %arg10[%c32, %c0_11] : memref<36x288xf32, #tpu.memory_space<vmem>>, vector<4x288xf32>
    tpu.vector_store %arg10[%c32, %c0_11], %18 {strides = array<i32>} : memref<36x288xf32, #tpu.memory_space<vmem>>, vector<4x288xf32>,
    %c0_12 = arith.constant 0 : index
    %c0_13 = arith.constant 0 : index
    %20 = vector.load %arg2[%c0_12, %c0_13] : memref<2x36xf32, #tpu.memory_space<vmem>>, vector<2x36xf32>
    %c0_14 = arith.constant 0 : index
    %c0_15 = arith.constant 0 : index
    %21 = vector.load %arg10[%c0_14, %c0_15] : memref<36x288xf32, #tpu.memory_space<vmem>>, vector<36x288xf32>
    %cst = arith.constant dense<0.000000e+00> : vector<2x288xf32>
    %22 = tpu.matmul %20, %21, %cst {dimension_numbers = #tpu.dot_dimension_numbers<[1], [0], [0], [1], [0, 0, 1, 1], [], []>} : vector<2x36xf32>, vector<36x288xf32>, vector<2x288xf32> -> vector<2x288xf32>
    %c0_16 = arith.constant 0 : index
    %c0_17 = arith.constant 0 : index
    %23 = vector.load %arg3[%c0_16, %c0_17] : memref<2x1xf32, #tpu.memory_space<vmem>>, vector<2x1xf32>
    %24 = vector.broadcast %23 : vector<2x1xf32> to vector<2x288xf32>
    %25 = arith.addf %22, %24 : vector<2x288xf32>
    %cst_18 = arith.constant 0.000000e+00 : f32
    %26 = vector.broadcast %cst_18 : f32 to vector<2x342xf32>
    %c0_19 = arith.constant 0 : index
    %c0_20 = arith.constant 0 : index
    %27 = vector.load %arg11[%c0_19, %c0_20] : memref<2x342xf32, #tpu.memory_space<vmem>>, vector<2x342xf32>
    tpu.vector_store %arg11[%c0_19, %c0_20], %26 {strides = array<i32>} : memref<2x342xf32, #tpu.memory_space<vmem>>, vector<2x342xf32>,
    %c0_21 = arith.constant 0 : index
    %c0_22 = arith.constant 0 : index
    %28 = vector.load %arg8[%c0_21, %c0_22] : memref<1x288xf32, #tpu.memory_space<vmem>>, vector<1x288xf32>
    %29 = vector.broadcast %28 : vector<1x288xf32> to vector<2x288xf32>
    %30 = arith.mulf %25, %29 : vector<2x288xf32>
    %c0_23 = arith.constant 0 : index
    %c19 = arith.constant 19 : index
    %31 = vector.load %arg11[%c0_23, %c19] : memref<2x342xf32, #tpu.memory_space<vmem>>, vector<2x288xf32>
    tpu.vector_store %arg11[%c0_23, %c19], %30 {strides = array<i32>} : memref<2x342xf32, #tpu.memory_space<vmem>>, vector<2x288xf32>,
    %c0_24 = arith.constant 0 : index
    %c0_25 = arith.constant 0 : index
    %32 = vector.load %arg11[%c0_24, %c0_25] : memref<2x342xf32, #tpu.memory_space<vmem>>, vector<2x342xf32>
    %33 = vector.extract_strided_slice %32 {offsets = [0, 0], sizes = [2, 288], strides = [1, 1]} : vector<2x342xf32> to vector<2x288xf32>
    %c0_26 = arith.constant 0 : index
    %c0_27 = arith.constant 0 : index
    %34 = vector.load %arg10[%c0_26, %c0_27] : memref<36x288xf32, #tpu.memory_space<vmem>>, vector<2x288xf32>
    tpu.vector_store %arg10[%c0_26, %c0_27], %33 {strides = array<i32>} : memref<36x288xf32, #tpu.memory_space<vmem>>, vector<2x288xf32>,
    %35 = vector.extract_strided_slice %32 {offsets = [0, 1], sizes = [2, 288], strides = [1, 1]} : vector<2x342xf32> to vector<2x288xf32>
    %c2 = arith.constant 2 : index
    %c0_28 = arith.constant 0 : index
    %36 = vector.load %arg10[%c2, %c0_28] : memref<36x288xf32, #tpu.memory_space<vmem>>, vector<2x288xf32>
    tpu.vector_store %arg10[%c2, %c0_28], %35 {strides = array<i32>} : memref<36x288xf32, #tpu.memory_space<vmem>>, vector<2x288xf32>,
    %37 = vector.extract_strided_slice %32 {offsets = [0, 2], sizes = [2, 288], strides = [1, 1]} : vector<2x342xf32> to vector<2x288xf32>
    %c4_29 = arith.constant 4 : index
    %c0_30 = arith.constant 0 : index
    %38 = vector.load %arg10[%c4_29, %c0_30] : memref<36x288xf32, #tpu.memory_space<vmem>>, vector<2x288xf32>
    tpu.vector_store %arg10[%c4_29, %c0_30], %37 {strides = array<i32>} : memref<36x288xf32, #tpu.memory_space<vmem>>, vector<2x288xf32>,
    %39 = vector.extract_strided_slice %32 {offsets = [0, 18], sizes = [2, 288], strides = [1, 1]} : vector<2x342xf32> to vector<2x288xf32>
    %c6 = arith.constant 6 : index
    %c0_31 = arith.constant 0 : index
    %40 = vector.load %arg10[%c6, %c0_31] : memref<36x288xf32, #tpu.memory_space<vmem>>, vector<2x288xf32>
    tpu.vector_store %arg10[%c6, %c0_31], %39 {strides = array<i32>} : memref<36x288xf32, #tpu.memory_space<vmem>>, vector<2x288xf32>,
    %41 = vector.extract_strided_slice %32 {offsets = [0, 19], sizes = [2, 288], strides = [1, 1]} : vector<2x342xf32> to vector<2x288xf32>
    %c8_32 = arith.constant 8 : index
    %c0_33 = arith.constant 0 : index
    %42 = vector.load %arg10[%c8_32, %c0_33] : memref<36x288xf32, #tpu.memory_space<vmem>>, vector<2x288xf32>
    tpu.vector_store %arg10[%c8_32, %c0_33], %41 {strides = array<i32>} : memref<36x288xf32, #tpu.memory_space<vmem>>, vector<2x288xf32>,
    %43 = vector.extract_strided_slice %32 {offsets = [0, 20], sizes = [2, 288], strides = [1, 1]} : vector<2x342xf32> to vector<2x288xf32>
    %c10 = arith.constant 10 : index
    %c0_34 = arith.constant 0 : index
    %44 = vector.load %arg10[%c10, %c0_34] : memref<36x288xf32, #tpu.memory_space<vmem>>, vector<2x288xf32>
    tpu.vector_store %arg10[%c10, %c0_34], %43 {strides = array<i32>} : memref<36x288xf32, #tpu.memory_space<vmem>>, vector<2x288xf32>,
    %45 = vector.extract_strided_slice %32 {offsets = [0, 36], sizes = [2, 288], strides = [1, 1]} : vector<2x342xf32> to vector<2x288xf32>
    %c12_35 = arith.constant 12 : index
    %c0_36 = arith.constant 0 : index
    %46 = vector.load %arg10[%c12_35, %c0_36] : memref<36x288xf32, #tpu.memory_space<vmem>>, vector<2x288xf32>
    tpu.vector_store %arg10[%c12_35, %c0_36], %45 {strides = array<i32>} : memref<36x288xf32, #tpu.memory_space<vmem>>, vector<2x288xf32>,
    %47 = vector.extract_strided_slice %32 {offsets = [0, 37], sizes = [2, 288], strides = [1, 1]} : vector<2x342xf32> to vector<2x288xf32>
    %c14 = arith.constant 14 : index
    %c0_37 = arith.constant 0 : index
    %48 = vector.load %arg10[%c14, %c0_37] : memref<36x288xf32, #tpu.memory_space<vmem>>, vector<2x288xf32>
    tpu.vector_store %arg10[%c14, %c0_37], %47 {strides = array<i32>} : memref<36x288xf32, #tpu.memory_space<vmem>>, vector<2x288xf32>,
    %49 = vector.extract_strided_slice %32 {offsets = [0, 38], sizes = [2, 288], strides = [1, 1]} : vector<2x342xf32> to vector<2x288xf32>
    %c16_38 = arith.constant 16 : index
    %c0_39 = arith.constant 0 : index
    %50 = vector.load %arg10[%c16_38, %c0_39] : memref<36x288xf32, #tpu.memory_space<vmem>>, vector<2x288xf32>
    tpu.vector_store %arg10[%c16_38, %c0_39], %49 {strides = array<i32>} : memref<36x288xf32, #tpu.memory_space<vmem>>, vector<2x288xf32>,
    %c0_40 = arith.constant 0 : index
    %c0_41 = arith.constant 0 : index
    %51 = vector.load %arg4[%c0_40, %c0_41] : memref<4x18xf32, #tpu.memory_space<vmem>>, vector<4x18xf32>
    %c0_42 = arith.constant 0 : index
    %c0_43 = arith.constant 0 : index
    %52 = vector.load %arg10[%c0_42, %c0_43] : memref<36x288xf32, #tpu.memory_space<vmem>>, vector<18x288xf32>
    %cst_44 = arith.constant dense<0.000000e+00> : vector<4x288xf32>
    %53 = tpu.matmul %51, %52, %cst_44 {dimension_numbers = #tpu.dot_dimension_numbers<[1], [0], [0], [1], [0, 0, 1, 1], [], []>} : vector<4x18xf32>, vector<18x288xf32>, vector<4x288xf32> -> vector<4x288xf32>
    %c0_45 = arith.constant 0 : index
    %c0_46 = arith.constant 0 : index
    %54 = vector.load %arg5[%c0_45, %c0_46] : memref<4x1xf32, #tpu.memory_space<vmem>>, vector<4x1xf32>
    %55 = vector.broadcast %54 : vector<4x1xf32> to vector<4x288xf32>
    %56 = arith.addf %53, %55 : vector<4x288xf32>
    %cst_47 = arith.constant 0.000000e+00 : f32
    %57 = vector.broadcast %cst_47 : f32 to vector<4x342xf32>
    %c0_48 = arith.constant 0 : index
    %c0_49 = arith.constant 0 : index
    %58 = vector.load %arg12[%c0_48, %c0_49] : memref<4x342xf32, #tpu.memory_space<vmem>>, vector<4x342xf32>
    tpu.vector_store %arg12[%c0_48, %c0_49], %57 {strides = array<i32>} : memref<4x342xf32, #tpu.memory_space<vmem>>, vector<4x342xf32>,
    %c0_50 = arith.constant 0 : index
    %c0_51 = arith.constant 0 : index
    %59 = vector.load %arg8[%c0_50, %c0_51] : memref<1x288xf32, #tpu.memory_space<vmem>>, vector<1x288xf32>
    %60 = vector.broadcast %59 : vector<1x288xf32> to vector<4x288xf32>
    %61 = arith.mulf %56, %60 : vector<4x288xf32>
    %c0_52 = arith.constant 0 : index
    %c19_53 = arith.constant 19 : index
    %62 = vector.load %arg12[%c0_52, %c19_53] : memref<4x342xf32, #tpu.memory_space<vmem>>, vector<4x288xf32>
    tpu.vector_store %arg12[%c0_52, %c19_53], %61 {strides = array<i32>} : memref<4x342xf32, #tpu.memory_space<vmem>>, vector<4x288xf32>,
    %c0_54 = arith.constant 0 : index
    %c0_55 = arith.constant 0 : index
    %63 = vector.load %arg12[%c0_54, %c0_55] : memref<4x342xf32, #tpu.memory_space<vmem>>, vector<4x342xf32>
    %64 = vector.extract_strided_slice %63 {offsets = [0, 0], sizes = [4, 288], strides = [1, 1]} : vector<4x342xf32> to vector<4x288xf32>
    %c0_56 = arith.constant 0 : index
    %c0_57 = arith.constant 0 : index
    %65 = vector.load %arg10[%c0_56, %c0_57] : memref<36x288xf32, #tpu.memory_space<vmem>>, vector<4x288xf32>
    tpu.vector_store %arg10[%c0_56, %c0_57], %64 {strides = array<i32>} : memref<36x288xf32, #tpu.memory_space<vmem>>, vector<4x288xf32>,
    %66 = vector.extract_strided_slice %63 {offsets = [0, 1], sizes = [4, 288], strides = [1, 1]} : vector<4x342xf32> to vector<4x288xf32>
    %c4_58 = arith.constant 4 : index
    %c0_59 = arith.constant 0 : index
    %67 = vector.load %arg10[%c4_58, %c0_59] : memref<36x288xf32, #tpu.memory_space<vmem>>, vector<4x288xf32>
    tpu.vector_store %arg10[%c4_58, %c0_59], %66 {strides = array<i32>} : memref<36x288xf32, #tpu.memory_space<vmem>>, vector<4x288xf32>,
    %68 = vector.extract_strided_slice %63 {offsets = [0, 2], sizes = [4, 288], strides = [1, 1]} : vector<4x342xf32> to vector<4x288xf32>
    %c8_60 = arith.constant 8 : index
    %c0_61 = arith.constant 0 : index
    %69 = vector.load %arg10[%c8_60, %c0_61] : memref<36x288xf32, #tpu.memory_space<vmem>>, vector<4x288xf32>
    tpu.vector_store %arg10[%c8_60, %c0_61], %68 {strides = array<i32>} : memref<36x288xf32, #tpu.memory_space<vmem>>, vector<4x288xf32>,
    %70 = vector.extract_strided_slice %63 {offsets = [0, 18], sizes = [4, 288], strides = [1, 1]} : vector<4x342xf32> to vector<4x288xf32>
    %c12_62 = arith.constant 12 : index
    %c0_63 = arith.constant 0 : index
    %71 = vector.load %arg10[%c12_62, %c0_63] : memref<36x288xf32, #tpu.memory_space<vmem>>, vector<4x288xf32>
    tpu.vector_store %arg10[%c12_62, %c0_63], %70 {strides = array<i32>} : memref<36x288xf32, #tpu.memory_space<vmem>>, vector<4x288xf32>,
    %72 = vector.extract_strided_slice %63 {offsets = [0, 19], sizes = [4, 288], strides = [1, 1]} : vector<4x342xf32> to vector<4x288xf32>
    %c16_64 = arith.constant 16 : index
    %c0_65 = arith.constant 0 : index
    %73 = vector.load %arg10[%c16_64, %c0_65] : memref<36x288xf32, #tpu.memory_space<vmem>>, vector<4x288xf32>
    tpu.vector_store %arg10[%c16_64, %c0_65], %72 {strides = array<i32>} : memref<36x288xf32, #tpu.memory_space<vmem>>, vector<4x288xf32>,
    %74 = vector.extract_strided_slice %63 {offsets = [0, 20], sizes = [4, 288], strides = [1, 1]} : vector<4x342xf32> to vector<4x288xf32>
    %c20_66 = arith.constant 20 : index
    %c0_67 = arith.constant 0 : index
    %75 = vector.load %arg10[%c20_66, %c0_67] : memref<36x288xf32, #tpu.memory_space<vmem>>, vector<4x288xf32>
    tpu.vector_store %arg10[%c20_66, %c0_67], %74 {strides = array<i32>} : memref<36x288xf32, #tpu.memory_space<vmem>>, vector<4x288xf32>,
    %76 = vector.extract_strided_slice %63 {offsets = [0, 36], sizes = [4, 288], strides = [1, 1]} : vector<4x342xf32> to vector<4x288xf32>
    %c24_68 = arith.constant 24 : index
    %c0_69 = arith.constant 0 : index
    %77 = vector.load %arg10[%c24_68, %c0_69] : memref<36x288xf32, #tpu.memory_space<vmem>>, vector<4x288xf32>
    tpu.vector_store %arg10[%c24_68, %c0_69], %76 {strides = array<i32>} : memref<36x288xf32, #tpu.memory_space<vmem>>, vector<4x288xf32>,
    %78 = vector.extract_strided_slice %63 {offsets = [0, 37], sizes = [4, 288], strides = [1, 1]} : vector<4x342xf32> to vector<4x288xf32>
    %c28_70 = arith.constant 28 : index
    %c0_71 = arith.constant 0 : index
    %79 = vector.load %arg10[%c28_70, %c0_71] : memref<36x288xf32, #tpu.memory_space<vmem>>, vector<4x288xf32>
    tpu.vector_store %arg10[%c28_70, %c0_71], %78 {strides = array<i32>} : memref<36x288xf32, #tpu.memory_space<vmem>>, vector<4x288xf32>,
    %80 = vector.extract_strided_slice %63 {offsets = [0, 38], sizes = [4, 288], strides = [1, 1]} : vector<4x342xf32> to vector<4x288xf32>
    %c32_72 = arith.constant 32 : index
    %c0_73 = arith.constant 0 : index
    %81 = vector.load %arg10[%c32_72, %c0_73] : memref<36x288xf32, #tpu.memory_space<vmem>>, vector<4x288xf32>
    tpu.vector_store %arg10[%c32_72, %c0_73], %80 {strides = array<i32>} : memref<36x288xf32, #tpu.memory_space<vmem>>, vector<4x288xf32>,
    %c0_74 = arith.constant 0 : index
    %c0_75 = arith.constant 0 : index
    %82 = vector.load %arg6[%c0_74, %c0_75] : memref<4x36xf32, #tpu.memory_space<vmem>>, vector<4x36xf32>
    %c0_76 = arith.constant 0 : index
    %c0_77 = arith.constant 0 : index
    %83 = vector.load %arg10[%c0_76, %c0_77] : memref<36x288xf32, #tpu.memory_space<vmem>>, vector<36x288xf32>
    %cst_78 = arith.constant dense<0.000000e+00> : vector<4x288xf32>
    %84 = tpu.matmul %82, %83, %cst_78 {dimension_numbers = #tpu.dot_dimension_numbers<[1], [0], [0], [1], [0, 0, 1, 1], [], []>} : vector<4x36xf32>, vector<36x288xf32>, vector<4x288xf32> -> vector<4x288xf32>
    %c0_79 = arith.constant 0 : index
    %c0_80 = arith.constant 0 : index
    %85 = vector.load %arg7[%c0_79, %c0_80] : memref<4x1xf32, #tpu.memory_space<vmem>>, vector<4x1xf32>
    %86 = vector.broadcast %85 : vector<4x1xf32> to vector<4x288xf32>
    %87 = arith.addf %84, %86 : vector<4x288xf32>
    %c0_81 = arith.constant 0 : index
    %c0_82 = arith.constant 0 : index
    %c0_83 = arith.constant 0 : index
    %88 = vector.load %arg9[%c0_81, %c0_82, %c0_83] : memref<1x4x288xf32, #tpu.memory_space<vmem>>, vector<1x4x288xf32>
    %89 = vector.shape_cast %88 : vector<1x4x288xf32> to vector<4x288xf32>
    %90 = vector.shape_cast %87 : vector<4x288xf32> to vector<1x4x288xf32>
    tpu.vector_store %arg9[%c0_81, %c0_82, %c0_83], %90 {strides = array<i32>} : memref<1x4x288xf32, #tpu.memory_space<vmem>>, vector<1x4x288xf32>,
    return
  }
  func.func @transform_0(%arg0: i32) -> (i32, i32, i32) {
    %c0_i32 = arith.constant 0 : i32
    %c0_i32_0 = arith.constant 0 : i32
    %c0_i32_1 = arith.constant 0 : i32
    return %arg0, %c0_i32, %c0_i32_0 : i32, i32, i32
  }
  func.func @transform_1(%arg0: i32) -> (i32, i32) {
    %c0_i32 = arith.constant 0 : i32
    %c0_i32_0 = arith.constant 0 : i32
    %c0_i32_1 = arith.constant 0 : i32
    return %c0_i32, %c0_i32_0 : i32, i32
  }
  func.func @transform_2(%arg0: i32) -> (i32, i32) {
    %c0_i32 = arith.constant 0 : i32
    %c0_i32_0 = arith.constant 0 : i32
    %c0_i32_1 = arith.constant 0 : i32
    return %c0_i32, %c0_i32_0 : i32, i32
  }
  func.func @transform_3(%arg0: i32) -> (i32, i32) {
    %c0_i32 = arith.constant 0 : i32
    %c0_i32_0 = arith.constant 0 : i32
    %c0_i32_1 = arith.constant 0 : i32
    return %c0_i32, %c0_i32_0 : i32, i32
  }
  func.func @transform_4(%arg0: i32) -> (i32, i32) {
    %c0_i32 = arith.constant 0 : i32
    %c0_i32_0 = arith.constant 0 : i32
    %c0_i32_1 = arith.constant 0 : i32
    return %c0_i32, %c0_i32_0 : i32, i32
  }
  func.func @transform_5(%arg0: i32) -> (i32, i32) {
    %c0_i32 = arith.constant 0 : i32
    %c0_i32_0 = arith.constant 0 : i32
    %c0_i32_1 = arith.constant 0 : i32
    return %c0_i32, %c0_i32_0 : i32, i32
  }
  func.func @transform_6(%arg0: i32) -> (i32, i32) {
    %c0_i32 = arith.constant 0 : i32
    %c0_i32_0 = arith.constant 0 : i32
    %c0_i32_1 = arith.constant 0 : i32
    return %c0_i32, %c0_i32_0 : i32, i32
  }
  func.func @transform_7(%arg0: i32) -> (i32, i32) {
    %c0_i32 = arith.constant 0 : i32
    %c0_i32_0 = arith.constant 0 : i32
    %c0_i32_1 = arith.constant 0 : i32
    return %c0_i32, %c0_i32_0 : i32, i32
  }
  func.func @transform_8(%arg0: i32) -> (i32, i32, i32) {
    %c0_i32 = arith.constant 0 : i32
    %c0_i32_0 = arith.constant 0 : i32
    %c0_i32_1 = arith.constant 0 : i32
    return %arg0, %c0_i32, %c0_i32_0 : i32, i32, i32
  }
}

</mosaic_0001>

<bundles_post_ra>
// kernel: tpu_custom_call.1
= control target key start
LH: loop header
LB: loop body
LE: loop exit
PB: predicated region body
PF: predicated region fallthrough
CT: control target
= control target key end

     0   :  { %13 = vsyncpa [#allocation6], 0  ;;  %s2165_s0 = inlined_call_operand.hbm [shape: f32[2,4,342], index: 0, kind: input, shape index: {}]   ;;  %s2166_s1 = inlined_call_operand.vmem [shape: f32[2,36], index: 1, kind: input, shape index: {}]   ;;  %s2167_s2 = inlined_call_operand.vmem [shape: f32[2,1], index: 2, kind: input, shape index: {}]   ;;  %s2168_s3 = inlined_call_operand.vmem [shape: f32[4,18], index: 3, kind: input, shape index: {}]   ;;  %s2169_s4 = inlined_call_operand.vmem [shape: f32[4,1], index: 4, kind: input, shape index: {}]   ;;  %s2170_s5 = inlined_call_operand.vmem [shape: f32[4,36], index: 5, kind: input, shape index: {}]   ;;  %s2171_s6 = inlined_call_operand.vmem [shape: f32[4,1], index: 6, kind: input, shape index: {}]   ;;  %s2172_s7 = inlined_call_operand.vmem [shape: f32[1,288], index: 7, kind: input, shape index: {}]   ;;  %s2173_s8 = inlined_call_operand.hbm [shape: f32[2,4,288], index: 8, kind: output, shape index: {}]  }
   0x1   :  { %15 = vsyncpa [#allocation6 + $0x1], 0 }
   0x2   :  { %16 = vsyncpa [#allocation7], 0 }
   0x3   :  { %18 = vsyncpa [#allocation7 + $0x1], 0  ;;  %s1778_s27 = smov 0   ;;  %s1780_s28 = smov 0  }
   0x4   :  { %s1782_s29 = smov 0   ;;  %s1784_s30 = smov 0  }
   0x5 LB: > { %s1799_s9 = sadd.s32 4294967295, %s1715_s30   ;;  %s1441_s10 = sadd.s32 4294967294, %s1715_s30   ;;  %s1715_s30 = sphi %s1784_s30, %s2210_s30   ;;  %s1711_s29 = sphi %s1782_s29, %s2209_s29   ;;  %s1707_s28 = sphi %s1780_s28, %s2208_s28   ;;  %s1703_s27 = sphi %s1778_s27, %s2207_s27  }
   0x6   : > { %s1803_s11 = sadd.s32 1, %s1715_s30   ;;  %s31_s12 = sadd.s32 1, %s1711_s29 }
   0x7   : > { %s28_s13 = ssub.s32 %s1715_s30, %s1803_s11  ;;  %p38_p0 = scmp.ne.s32.totalorder %s1711_s29, %s1707_s28 }
   0x8   : > { %p29_p1 = scmp.eq.s32.totalorder %s28_s13, 0  ;;  %p39_p2 = scmp.eq.s32.totalorder %s1715_s30, 0 }
   0x9   : > { %p44_p3 = scmp.ne.s32.totalorder %s1707_s28, %s1703_s27  ;;  %p45_p4 = scmp.eq.s32.totalorder %s1799_s9, 0 }
   0xa   : > { %s1815_s14 = scalar_select %p29_p1, %s1711_s29, %s31_s12  }
   0xb   : > { %p40_p5 = por %p39_p2, %p38_p0  ;;  %p1817_p6 = por %p45_p4, %p44_p3 }
   0xc   : > { %2180 = sst [smem:[#allocation11_spill]] %s1815_s14  ;;  %p215_p7 = scmp.eq.s32.totalorder %s1799_s9, 1 }
   0xd   : > { %p221_p8 = scmp.eq.s32.totalorder %s1441_s10, 1  ;;  %p1567_p10 = scmp.lt.s32.totalorder %s1715_s30, 2 }
   0xe   : > { %p1824_p11 = por %p215_p7, %p38_p0  ;;  %s262_s18 = sand.u32 1, %s1711_s29  }
   0xf   : > { %p1828_p12 = por %p221_p8, %p44_p3  ;;  %s1552_s19 = smul.u32 192, %s1715_s30 }
  0x10   : > { %s2182_s16 = scalar_select %p1824_p11, 1, 0 }
  0x11   : > { %s2183_s17 = scalar_select %p1828_p12, 1, 0 }
  0x12   : > { %s1551_s20 = smul.u32 12, %s262_s18  ;;  %s1837_s23 = scalar_lea.hbm %s2165_s0, %s1552_s19 }
  0x13   : > { %p1839_p13 = pnand %p1567_p10, %p40_p5  ;;  %s263_s10 = scalar_lea.sflag [#allocation6], %s262_s18 }
  0x14   : > { %s266_s25 = scalar_lea.vmem [#allocation5], %s1551_s20  ;;  %s1619_s12 = scalar_lea.hbm %s1837_s23, 192 }
  0x15   : > { %s274_s26 = sshll.u32 %s266_s25, 4  ;;  %p1620_p2 = scmp.ne.s32.totalorder %s1837_s23, %s1619_s12  ;;  %s1844_s26 = int_to_ptr.vmem [resolvable:$true] %s274_s26 }
  0x16   : > { %p1621_p3 = pneg %p1839_p13  ;;  %s1624_s21 = scalar_lea.hbm %s2165_s0, 384 }
  0x17   : > { %p1625_p7 = scmp.lt.u32.totalorder %s1837_s23, %s2165_s0  ;;  %p1626_p8 = scmp.lt.u32.totalorder %s1624_s21, %s1619_s12 }
  0x18   : > { %p1622_p4 = pnand %p1621_p3, %p1620_p2  ;;  %p1628_p9 = scmp.lt.u32.totalorder %s1619_s12, %s1837_s23 }
  0x19   : > { %p1627_p10 = por %p1626_p8, %p1625_p7 }
  0x1a   : > { %p1623_p5 = pneg %p1622_p4 }
  0x1b   : > { %p1629_p0 = por %p1628_p9, %p1627_p10 }
  0x1d   : > { %p1630_p1 = pnand %p1629_p0, %p1623_p5 }
  0x1f   : > { %1633 = shalt.err (!%p1630_p1)
}
  0x20   : > { %s1634_s18 = scalar_lea.vmem %s1844_s26, 192  ;;  %s1717_s20 = smov [#allocation5]  }
  0x21   : > { %p1635_p2 = scmp.ne.s32.totalorder %s1844_s26, %s1634_s18  ;;  %s1639_s25 = sshll.u32 %s1717_s20, 4  ;;  %s1640_s25 = int_to_ptr.vmem [resolvable:$false] %s1639_s25 }
  0x22   : > { %s1641_s14 = scalar_lea.vmem %s1640_s25, 384  ;;  %p1642_p11 = scmp.lt.s32.totalorder %s1844_s26, %s1640_s25 }
  0x23   : > { %p1637_p4 = pnand %p1635_p2, %p1621_p3  ;;  %p1643_p7 = scmp.lt.s32.totalorder %s1641_s14, %s1634_s18 }
  0x25   : > { %p1638_p12 = pneg %p1637_p4  ;;  %p1644_p8 = por %p1643_p7, %p1642_p11 }
  0x27   : > { %p1645_p9 = pnand %p1644_p8, %p1638_p12 }
  0x29   : > { %1648 = shalt.err (!%p1645_p9)
}
  0x2a   : > { %1562 = dma.hbm_to_vmem [thread:$0]  (!%p1839_p13), %s1837_s23, 192, %s1844_s26, %s263_s10  }
  0x2b   : > { %p2185_p0 = scmp.lt.s32.totalorder %s1715_s30, 3  ;;  %p2186_p1 = scmp.ge.s32.totalorder %s1715_s30, 1 }
  0x2d   : > { %p280_p3 = pnand %p2186_p1, %p2185_p0 }
  0x2e   : > { %s1877_s12 = sand.u32 (!%p280_p3), 1, %s1707_s28  }
  0x2f   : > { %283 = sbr.rel (%p280_p3) target bundleno = 1497 (0x5d9), region = 52  ;;  %s286_s19 = scalar_lea.sflag (!%p280_p3), [#allocation6], %s1877_s12 }
  0x30   : > { %s1553_s13 = smul.u32 (!%p280_p3), 12, %s1877_s12 }
  0x32   : > { %s289_s24 = scalar_lea.vmem (!%p280_p3), [#allocation5], %s1553_s13 }
  0x36   : > { %1694 = dma.done.wait (%p1817_p6), %s286_s19, 192  }
  0x37   : > { %1696 = vsyncadd (%p1817_p6), %s286_s19, 4294967104  ;;  %v323_v0 = vld [vmem:[%s289_s24 + $0x8] sm:$0xf]  ;;  %vm2176_vm0 = vcmask 257024   ;;  %v322_v1 = vld [vmem:[%s289_s24] sm:$0xff]  ;;  %s1718_s23 = smov 126  }
  0x38   : > { %354 = vrot.lane.b32.xlu1 %v323_v0, %s1718_s23  ;;  %331 = vst.msk [vmem:[#allocation2 + $0x10] sm:$0xf] %vm2176_vm0, %v323_v0  ;;  %s1719_s26 = smov 127   ;;  %328 = vst [vmem:[#allocation2] sm:$0xf] %v322_v1  ;;  %v326_v2 = vcombine.high %v322_v1, %v322_v1  ;;  %s1720_s10 = smov 110   ;;  %v333_v3 = vcombine.low %v323_v0, %v323_v0  ;;  %v332_v5 = vcombine.low %v322_v1, %v322_v1 }
  0x39   : > { %336 = vrot.lane.b32.xlu0 %v322_v1, %s1719_s26  ;;  %v1721_v4 = vmov 0.0|0.0   ;;  %s1722_s15 = smov 109   ;;  %s1723_s21 = smov 108   ;;  %v1726_v6 = vmov 0.0   ;;  %vm2179_vm1 = vmmov 0   ;;  %v1729_v7 = vmov 0  }
  0x3a   : > { %329 = vst [vmem:[#allocation2 + $0x8] sm:$0xf] %v326_v2  ;;  %1524 = vmatprep.subr.bf16.mxu1 %v1721_v4  ;;  %s1724_s22 = smov 92   ;;  %s1725_s18 = smov 91   ;;  %1010 = vst [vmem:[#allocation4] sm:$0xff] %v1726_v6  ;;  %555 = vmatprep.mubr.f32.mxu0 %v1726_v6  ;;  %vm356_vm2 = vcmask 1031168  }
  0x3b   : > { %s1727_s20 = smov 90   ;;  %1491 = vmatprep.mubr.msk.f32.mxu1 %vm2179_vm1, %v1726_v6  ;;  %1615 = vset.pattern.permute.xlu0 %v1729_v7  ;;  %v471_v8 = vld [vmem:[%s2167_s2] sm:$0x3]  ;;  %vm340_vm3 = vcmask 1039360   ;;  %vm2175_vm4 = vcmask 261124   ;;  %vm371_vm5 = vcmask 900096  }
  0x3c   : > { %352 = vrot.lane.b32.xlu1 %v326_v2, %s1718_s23  ;;  %vm386_vm6 = vcmask 891904   ;;  %vm401_vm7 = vcmask 883712   ;;  %vm416_vm8 = vcmask 752640   ;;  %vm431_vm9 = vcmask 744448   ;;  %s1731_s19 = smov 19   ;;  %p2203_p11 = scmp.ne.s32.totalorder %s2182_s16, 0 }
  0x3d   : > { %367 = vrot.lane.b32.xlu0 %v322_v1, %s1720_s10  ;;  %1616 = vset.pattern.permute.xlu1 %v1729_v7  ;;  %vm446_vm10 = vcmask 736256   ;;  %vm2178_vm11 = vcmask 1043456   ;;  %vm2177_vm12 = vcmask 293888   ;;  %vm632_vm13 = vcmask 1041408  }
  0x3e   : > { %vm633_vm14 = vcmask 1043458   ;;  %vm635_vm15 = vcmask 701444  }
  0x40   : > { %369 = vrot.lane.b32.xlu1 %v333_v3, %s1720_s10 }
  0x41   : > { %338 = vrot.lane.b32.xlu0 %v333_v3, %s1719_s26 }
  0x44   : > { %350 = vrot.lane.b32.xlu1 %v322_v1, %s1718_s23 }
  0x45   : > { %334 = vrot.lane.b32.xlu0 %v332_v5, %s1719_s26 }
  0x48   : > { %382 = vrot.lane.b32.xlu1 %v326_v2, %s1722_s15 }
  0x49   : > { %365 = vrot.lane.b32.xlu0 %v332_v5, %s1720_s10 }
  0x4c   : > { %397 = vrot.lane.b32.xlu1 %v322_v1, %s1723_s21 }
  0x4d   : > { %384 = vrot.lane.b32.xlu0 %v323_v0, %s1722_s15 }
  0x50   : > { %412 = vrot.lane.b32.xlu1 %v326_v2, %s1724_s22 }
  0x51   : > { %399 = vrot.lane.b32.xlu0 %v333_v3, %s1723_s21 }
  0x54   : > { %427 = vrot.lane.b32.xlu1 %v322_v1, %s1725_s18 }
  0x55   : > { %414 = vrot.lane.b32.xlu0 %v323_v0, %s1724_s22 }
  0x58   : > { %380 = vrot.lane.b32.xlu1 %v322_v1, %s1722_s15 }
  0x59   : > { %429 = vrot.lane.b32.xlu0 %v333_v3, %s1725_s18  ;;  %v455_v3 = vld [vmem:[%s2166_s1] sm:$0x3] }
  0x5c   : > { %410 = vrot.lane.b32.xlu1 %v322_v1, %s1724_s22 }
  0x5d   : > { %395 = vrot.lane.b32.xlu0 %v332_v5, %s1723_s21 }
  0x60   : > { %442 = vrot.lane.b32.xlu1 %v326_v2, %s1727_s20 }
  0x61   : > { %425 = vrot.lane.b32.xlu0 %v332_v5, %s1725_s18 }
  0x64   : > { %440 = vrot.lane.b32.xlu1 %v322_v1, %s1727_s20 }
  0x65   : > { %444 = vrot.lane.b32.xlu0 %v323_v0, %s1727_s20 }
  0x69   : > { %474 = vperm.xlu0 %1615, %v471_v8  }
  0xaa   : > { %v355_v9 = vpop.permute.xlu1 %354 }
  0xab   : > { %v337_v10 = vpop.permute.xlu0 %336  ;;  %364 = vst.msk [vmem:[#allocation2 + $0x28] sm:$0xf] %vm2176_vm0, %v355_v9 }
  0xae   : > { %v353_v12 = vpop.permute.xlu1 %352 }
  0xaf   : > { %v368_v11 = vpop.permute.xlu0 %367  ;;  %v358_v13 = vsel %vm356_vm2, %v353_v12, %v355_v9  ;;  %v640_v9 = vlaneseq }
  0xb0   : > { %363 = vst [vmem:[#allocation2 + $0x20] sm:$0xf] %v358_v13 }
  0xb2   : > { %v370_v15 = vpop.permute.xlu1 %369 }
  0xb3   : > { %v339_v14 = vpop.permute.xlu0 %338  ;;  %v373_v17 = vsel %vm371_vm5, %v368_v11, %v370_v15  ;;  %379 = vst.msk [vmem:[#allocation2 + $0x28] sm:$0xf0] %vm2175_vm4, %v370_v15  ;;  %v1730_v15 = vmov 1983009808  }
  0xb4   : > { %v342_v16 = vsel %vm340_vm3, %v337_v10, %v339_v14  ;;  %349 = vst.msk [vmem:[#allocation2 + $0x10] sm:$0xf0] %vm2175_vm4, %v339_v14  ;;  %378 = vst [vmem:[#allocation2 + $0x20] sm:$0xf0] %v373_v17 }
  0xb5   : > { %347 = vst [vmem:[#allocation2 + $0x8] sm:$0xf0] %v342_v16  ;;  %v663_v16 = vunpack.c.l.s4 %v1730_v15 }
  0xb6   : > { %v351_v19 = vpop.permute.xlu1 %350 }
  0xb7   : > { %v335_v18 = vpop.permute.xlu0 %334  ;;  %v357_v21 = vsel %vm356_vm2, %v351_v19, %v353_v12  ;;  %v638_v12 = vld [vmem:[%s2172_s7] sm:$0x7] }
  0xb8   : > { %v341_v20 = vsel %vm340_vm3, %v335_v18, %v337_v10  ;;  %362 = vst [vmem:[#allocation2 + $0x18] sm:$0xf] %v357_v21  ;;  %v1961_v10 = vshrl.u32 %v640_v9, 7 }
  0xb9   : > { %346 = vst [vmem:[#allocation2] sm:$0xf0] %v341_v20 }
  0xba   : > { %v383_v23 = vpop.permute.xlu1 %382  ;;  %v461_v25 = vld [vmem:[#allocation2 + $0x28] sm:$0xff]  ;;  %v646_v13 = vsub.s32 1, %v1961_v10  ;;  %v650_v14 = vsub.s32 2, %v1961_v10 }
  0xbb   : > { %v366_v22 = vpop.permute.xlu0 %365  ;;  %v458_v24 = vld [vmem:[#allocation2 + $0x10] sm:$0xff]  ;;  %v460_v29 = vld [vmem:[#allocation2 + $0x20] sm:$0xff] }
  0xbc   : > { %v372_v26 = vsel %vm371_vm5, %v366_v22, %v368_v11  ;;  %v1525_v27 = vpack.c.bf16 %v461_v25, %v458_v24  ;;  %v457_v28 = vld [vmem:[#allocation2 + $0x8] sm:$0xff]  ;;  %v642_v11 = vsub.s32 0, %v1961_v10  ;;  %v647_v22 = vrot.slane %v638_v12, %v646_v13 }
  0xbd   : > { %377 = vst [vmem:[#allocation2 + $0x18] sm:$0xf0] %v372_v26  ;;  %v1516_v30 = vpack.c.bf16 %v460_v29, %v457_v28  ;;  %v651_v24 = vrot.slane %v638_v12, %v650_v14  ;;  %v664_v25 = vunpack.c.0.s8 %v663_v16 }
  0xbe   : > { %1526 = vmatpush3.bf16.msra.mxu1 %v1525_v27  ;;  %v398_v32 = vpop.permute.xlu1 %397  ;;  %v643_v20 = vrot.slane %v638_v12, %v642_v11 }
  0xbf   : > { %v385_v31 = vpop.permute.xlu0 %384  ;;  %1517 = vmatprep.subr.bf16.mxu0 %v1516_v30  ;;  %1527 = vmatprep.subr.bf16.mxu1 %v1721_v4 }
  0xc0   : > { %v388_v33 = vsel %vm386_vm6, %v383_v23, %v385_v31  ;;  %394 = vst.msk [vmem:[#allocation2 + $0x40] sm:$0xf] %vm2176_vm0, %v385_v31  ;;  %v456_v37 = vld [vmem:[#allocation2] sm:$0xff] }
  0xc1   : > { %393 = vst [vmem:[#allocation2 + $0x38] sm:$0xf] %v388_v33 }
  0xc2   : > { %v413_v35 = vpop.permute.xlu1 %412 }
  0xc3   : > { %v400_v34 = vpop.permute.xlu0 %399 }
  0xc4   : > { %v403_v36 = vsel %vm401_vm7, %v398_v32, %v400_v34  ;;  %409 = vst.msk [vmem:[#allocation2 + $0x40] sm:$0xf0] %vm2175_vm4, %v400_v34  ;;  %v459_v38 = vld [vmem:[#allocation2 + $0x18] sm:$0xff] }
  0xc5   : > { %408 = vst [vmem:[#allocation2 + $0x38] sm:$0xf0] %v403_v36  ;;  %v1518_v39 = vpack.c.bf16 %v459_v38, %v456_v37 }
  0xc6   : > { %v428_v41 = vpop.permute.xlu1 %427 }
  0xc7   : > { %v415_v40 = vpop.permute.xlu0 %414  ;;  %1519 = vmatpush1.bf16.msra.mxu0 %v1518_v39 }
  0xc8   : > { %v418_v42 = vsel %vm416_vm8, %v413_v35, %v415_v40  ;;  %424 = vst.msk [vmem:[#allocation2 + $0x58] sm:$0xf] %vm2176_vm0, %v415_v40 }
  0xc9   : > { %423 = vst [vmem:[#allocation2 + $0x50] sm:$0xf] %v418_v42 }
  0xca   : > { %v381_v44 = vpop.permute.xlu1 %380 }
  0xcb   : > { %v430_v43 = vpop.permute.xlu0 %429  ;;  %v387_v46 = vsel %vm386_vm6, %v381_v44, %v383_v23  ;;  %v464_v53 = vld [vmem:[#allocation2 + $0x40] sm:$0xff] }
  0xcc   : > { %v433_v45 = vsel %vm431_vm9, %v428_v41, %v430_v43  ;;  %439 = vst.msk [vmem:[#allocation2 + $0x58] sm:$0xf0] %vm2175_vm4, %v430_v43  ;;  %392 = vst [vmem:[#allocation2 + $0x30] sm:$0xf] %v387_v46  ;;  %v463_v57 = vld [vmem:[#allocation2 + $0x38] sm:$0xff] }
  0xcd   : > { %438 = vst [vmem:[#allocation2 + $0x50] sm:$0xf0] %v433_v45  ;;  %vm634_vm4 = vmor %vm633_vm14, %vm632_vm13 }
  0xce   : > { %v411_v48 = vpop.permute.xlu1 %410 }
  0xcf   : > { %v396_v47 = vpop.permute.xlu0 %395  ;;  %v417_v50 = vsel %vm416_vm8, %v411_v48, %v413_v35 }
  0xd0   : > { %v402_v49 = vsel %vm401_vm7, %v396_v47, %v398_v32  ;;  %422 = vst [vmem:[#allocation2 + $0x48] sm:$0xf] %v417_v50  ;;  %v667_v32 = vsub.s32 %v664_v25, %v1961_v10 }
  0xd1   : > { %407 = vst [vmem:[#allocation2 + $0x30] sm:$0xf0] %v402_v49 }
  0xd2   : > { %v443_v52 = vpop.permute.xlu1 %442 }
  0xd3   : > { %v426_v51 = vpop.permute.xlu0 %425  ;;  %v467_v54 = vld [vmem:[#allocation2 + $0x58] sm:$0xff] }
  0xd4   : > { %v432_v55 = vsel %vm431_vm9, %v426_v51, %v428_v41  ;;  %v1528_v56 = vpack.c.bf16 %v467_v54, %v464_v53  ;;  %v466_v58 = vld [vmem:[#allocation2 + $0x50] sm:$0xff]  ;;  %v850_v51 = vld [vmem:[%s2169_s4] sm:$0xf] }
  0xd5   : > { %437 = vst [vmem:[#allocation2 + $0x48] sm:$0xf0] %v432_v55  ;;  %v1520_v59 = vpack.c.bf16 %v466_v58, %v463_v57 }
  0xd6   : > { %1529 = vmatpush3.bf16.msra.mxu1 %v1528_v56  ;;  %v441_v61 = vpop.permute.xlu1 %440 }
  0xd7   : > { %v445_v60 = vpop.permute.xlu0 %444  ;;  %1521 = vmatprep.subr.bf16.mxu0 %v1520_v59  ;;  %1489 = vmatprep.subr.mxu1 %v1726_v6  ;;  %v447_v63 = vsel %vm446_vm10, %v441_v61, %v443_v52 }
  0xd8   : > { %v448_v62 = vsel %vm446_vm10, %v443_v52, %v445_v60  ;;  %454 = vst.msk [vmem:[#allocation2 + $0x70] sm:$0xf] %vm2176_vm0, %v445_v60  ;;  %452 = vst [vmem:[#allocation2 + $0x60] sm:$0xf] %v447_v63  ;;  %v462_v0 = vld [vmem:[#allocation2 + $0x30] sm:$0xff] }
  0xd9   : > { %453 = vst [vmem:[#allocation2 + $0x68] sm:$0xf] %v448_v62  ;;  %vm636_vm0 = vmor %vm635_vm15, %vm634_vm4  ;;  %vm685_vm15 = vcmask 414724  }
  0xda   : > { %637 = vst.msk [vmem:[#allocation3] sm:$0x3f] %vm636_vm0, %v1726_v6  ;;  %vm683_vm0 = vcmask 1041560  }
  0xdb   : > { %vm684_vm4 = vmor %vm633_vm14, %vm683_vm0  ;;  %vm768_vm14 = vcmask 261126   ;;  %vm752_vm0 = vcmask 259076  }
  0xdc   : > { %v465_v1 = vld [vmem:[#allocation2 + $0x48] sm:$0xff] }
  0xdd   : > { %v1522_v2 = vpack.c.bf16 %v465_v1, %v462_v0 }
  0xdf   : > { %1523 = vmatpush1.bf16.msra.mxu0 %v1522_v2  ;;  %v470_v5 = vld [vmem:[#allocation2 + $0x70] sm:$0xf]  ;;  %v468_v8 = vld [vmem:[#allocation2 + $0x60] sm:$0xf] }
  0xe0   : > { %v469_v7 = vld [vmem:[#allocation2 + $0x68] sm:$0xf]  ;;  %1490 = vmatpush3.msk.msra.mxu1 %vm2178_vm11, %v470_v5 }
  0xe1   : > { %1446 = vmatprep.subr.msk.mxu0 %vm2178_vm11, %v469_v7  ;;  %1492 = vmatmul.mubr.msk.f32.vlgmr.msra.gmra.mrb[0].mxu1 %vm2177_vm12, %v455_v3 }
  0xe2   : > { %1534 = vmatprep.subr.bf16.mxu1 %v1721_v4  ;;  %1500 = vmatprep.mubr.msk.f32.mxu1 %vm2179_vm1, %v1726_v6  ;;  %vm711_vm1 = vcmask 254976  }
  0xe3   : > { %1447 = vmatpush1.msk.msra.mxu0 %vm2178_vm11, %v468_v8  ;;  %vm686_vm11 = vmor %vm685_vm15, %vm684_vm4  ;;  %vm2187_vm4 = vmmov 0   ;;  %vm1011_vm15 = vcmask 699392  }
  0xe4   : > { %1448 = vmatmul.mubr.msk.f32.vlgmr.msra.gmra.mrb[0].mxu0 %vm2177_vm12, %v455_v3  ;;  %vm680_vm12 = vcmask 154624   ;;  %1012 = vst.msk [vmem:[#allocation4 + $0x8] sm:$0xf] %vm1011_vm15, %v1726_v6 }
  0xe5   : > { %933 = vmatprep.mubr.f32.mxu0 %v1726_v6 }
  0xe8   : > { %v475_v17 = vpop.permute.xlu0 %474 }
 0x1b4   : > { %v628_v18 = vpop.f32.mrb[0].mxu1 }
 0x1b5   : > { %v1493_v19 = vpop.f32.mrb[1].mxu1  ;;  %v629_v23 = vadd.f32 %v628_v18, %v475_v17 }
 0x1b7   : > { %v557_v21 = vpop.f32.mrb[0].mxu0  ;;  %v657_v31 = vmul.f32 %v651_v24, %v629_v23 }
 0x1b8   : > { %v558_v26 = vadd.f32 %v557_v21, %v475_v17  ;;  %v559_v27 = vpop.f32.mrb[1].mxu0 }
 0x1b9   : > { %v560_v28 = vadd.f32 %v559_v27, %v475_v17  ;;  %v675_v34 = vrot.slane %v657_v31, %v667_v32 }
 0x1ba   : > { %v655_v29 = vmul.f32 %v643_v20, %v558_v26 }
 0x1bb   : > { %v656_v30 = vmul.f32 %v647_v22, %v560_v28 }
 0x1bd   : > { %v661_v33 = vcombine.low %v655_v29, %v656_v30 }
 0x1bf   : > { %v668_v35 = vrot.slane %v661_v33, %v667_v32 }
 0x1c1   : > { %v676_v36 = vcombine.low %v668_v35, %v675_v34 }
 0x1c3   : > { %677 = vrot.lane.b32.xlu1 %v676_v36, %s1731_s19 }
 0x235   : > { %v678_v37 = vpop.permute.xlu1 %677 }
 0x236   : > { %v679_v38 = vrot.slane %v678_v37, 6 }
 0x238   : > { %v681_v39 = vsel %vm680_vm12, %v679_v38, %v678_v37 }
 0x239   : > { %687 = vst.msk [vmem:[#allocation3] sm:$0x3f] %vm686_vm11, %v681_v39  ;;  %vm735_vm11 = vcmask 257026  }
 0x240   : > { %v688_v40 = vld [vmem:[#allocation3] sm:$0x3f] }
 0x241   : > { %v697_v41 = vrot.slane %v688_v40, %v667_v32  ;;  %1451 = vst.sshfl [vmem:[#allocation2] sm:$0x3 pattern:$0x76325410] %v688_v40  ;;  %v690_v42 = vcombine.high %v688_v40, %v688_v40  ;;  %v713_v45 = vcombine.low %v688_v40, %v688_v40 }
 0x243   : > { %741 = vrot.lane.b32.xlu1 %v697_v41, %s1718_s23  ;;  %726 = vrot.lane.b32.xlu0 %v697_v41, %s1719_s26  ;;  %v705_v43 = vcombine.high %v697_v41, %v697_v41  ;;  %v704_v44 = vrot.slane %v690_v42, %v667_v32  ;;  %v720_v46 = vrot.slane %v713_v45, %v667_v32 }
 0x244   : > { %v737_v47 = vcombine.low %v697_v41, %v697_v41 }
 0x245   : > { %710 = vst [vmem:[#allocation2 + $0x8] sm:$0x3] %v705_v43  ;;  %712 = vst.msk [vmem:[#allocation2 + $0x10] sm:$0x3] %vm711_vm1, %v704_v44  ;;  %v721_v48 = vcombine.high %v720_v46, %v720_v46  ;;  %v738_v49 = vcombine.low %v704_v44, %v704_v44  ;;  %v754_v50 = vcombine.low %v720_v46, %v720_v46 }
 0x247   : > { %800 = vrot.lane.b32.xlu1 %v697_v41, %s1724_s22  ;;  %788 = vrot.lane.b32.xlu0 %v697_v41, %s1723_s21 }
 0x24b   : > { %757 = vrot.lane.b32.xlu1 %v720_v46, %s1720_s10  ;;  %770 = vrot.lane.b32.xlu0 %v697_v41, %s1722_s15 }
 0x24f   : > { %759 = vrot.lane.b32.xlu0 %v737_v47, %s1720_s10  ;;  %772 = vrot.lane.b32.xlu1 %v705_v43, %s1722_s15 }
 0x253   : > { %814 = vrot.lane.b32.xlu1 %v720_v46, %s1725_s18  ;;  %774 = vrot.lane.b32.xlu0 %v704_v44, %s1722_s15 }
 0x257   : > { %722 = vrot.lane.b32.xlu1 %v720_v46, %s1719_s26  ;;  %816 = vrot.lane.b32.xlu0 %v737_v47, %s1725_s18 }
 0x25b   : > { %784 = vrot.lane.b32.xlu1 %v720_v46, %s1723_s21  ;;  %739 = vrot.lane.b32.xlu0 %v737_v47, %s1718_s23 }
 0x25f   : > { %724 = vrot.lane.b32.xlu1 %v721_v48, %s1719_s26  ;;  %798 = vrot.lane.b32.xlu0 %v737_v47, %s1724_s22  ;;  %v1013_v47 = vld [vmem:[%s2172_s7] sm:$0x7] }
 0x263   : > { %786 = vrot.lane.b32.xlu1 %v721_v48, %s1723_s21  ;;  %743 = vrot.lane.b32.xlu0 %v738_v49, %s1718_s23 }
 0x267   : > { %755 = vrot.lane.b32.xlu1 %v754_v50, %s1720_s10  ;;  %802 = vrot.lane.b32.xlu0 %v738_v49, %s1724_s22  ;;  %v1026_v49 = vrot.slane %v1013_v47, %v650_v14 }
 0x26b   : > { %812 = vrot.lane.b32.xlu1 %v754_v50, %s1725_s18  ;;  %828 = vrot.lane.b32.xlu0 %v705_v43, %s1727_s20  ;;  %v840_v43 = vld [vmem:[%s2168_s3] sm:$0xf] }
 0x26f   : > { %830 = vrot.lane.b32.xlu1 %v704_v44, %s1727_s20  ;;  %826 = vrot.lane.b32.xlu0 %v697_v41, %s1727_s20 }
 0x273   : > { %853 = vperm.xlu1 %1616, %v850_v51  }
 0x2b5   : > { %v742_v52 = vpop.permute.xlu1 %741  ;;  %v727_v53 = vpop.permute.xlu0 %726 }
 0x2b6   : > { %736 = vst.msk [vmem:[#allocation2 + $0x10] sm:$0xc] %vm735_vm11, %v727_v53 }
 0x2b9   : > { %v801_v54 = vpop.permute.xlu1 %800  ;;  %v789_v55 = vpop.permute.xlu0 %788 }
 0x2ba   : > { %797 = vst.msk [vmem:[#allocation2 + $0x28] sm:$0xc] %vm735_vm11, %v789_v55  ;;  %vm1047_vm11 = vcmask 1047556  }
 0x2bd   : > { %v758_v56 = vpop.permute.xlu1 %757  ;;  %v771_v57 = vpop.permute.xlu0 %770 }
 0x2c1   : > { %v760_v58 = vpop.permute.xlu0 %759  ;;  %v773_v59 = vpop.permute.xlu1 %772 }
 0x2c2   : > { %v762_v60 = vsel %vm371_vm5, %v758_v56, %v760_v58  ;;  %769 = vst.msk [vmem:[#allocation2 + $0x10] sm:$0xc0] %vm768_vm14, %v760_v58  ;;  %v776_v61 = vsel %vm386_vm6, %v771_v57, %v773_v59 }
 0x2c3   : > { %767 = vst [vmem:[#allocation2 + $0x8] sm:$0xc0] %v762_v60  ;;  %781 = vst [vmem:[#allocation2 + $0x18] sm:$0x3] %v776_v61 }
 0x2c5   : > { %v815_v62 = vpop.permute.xlu1 %814  ;;  %v775_v63 = vpop.permute.xlu0 %774 }
 0x2c6   : > { %v777_v0 = vsel %vm386_vm6, %v773_v59, %v775_v63  ;;  %783 = vst.msk [vmem:[#allocation2 + $0x28] sm:$0x3] %vm711_vm1, %v775_v63 }
 0x2c7   : > { %782 = vst [vmem:[#allocation2 + $0x20] sm:$0x3] %v777_v0 }
 0x2c9   : > { %v723_v1 = vpop.permute.xlu1 %722  ;;  %v817_v2 = vpop.permute.xlu0 %816 }
 0x2ca   : > { %v819_v3 = vsel %vm431_vm9, %v815_v62, %v817_v2  ;;  %825 = vst.msk [vmem:[#allocation2 + $0x28] sm:$0xc0] %vm768_vm14, %v817_v2 }
 0x2cb   : > { %824 = vst [vmem:[#allocation2 + $0x20] sm:$0xc0] %v819_v3 }
 0x2cd   : > { %v785_v5 = vpop.permute.xlu1 %784  ;;  %v740_v7 = vpop.permute.xlu0 %739 }
 0x2ce   : > { %v745_v8 = vsel %vm356_vm2, %v740_v7, %v742_v52  ;;  %v1191_v7 = vld [vmem:[%s2171_s6] sm:$0xf] }
 0x2cf   : > { %750 = vst [vmem:[#allocation2] sm:$0x30] %v745_v8 }
 0x2d1   : > { %v725_v9 = vpop.permute.xlu1 %724  ;;  %v799_v12 = vpop.permute.xlu0 %798 }
 0x2d2   : > { %v728_v15 = vsel %vm340_vm3, %v723_v1, %v725_v9  ;;  %v729_v16 = vsel %vm340_vm3, %v725_v9, %v727_v53  ;;  %v804_v17 = vsel %vm416_vm8, %v799_v12, %v801_v54  ;;  %v1018_v53 = vrot.slane %v1013_v47, %v642_v11 }
 0x2d3   : > { %733 = vst [vmem:[#allocation2] sm:$0xc] %v728_v15  ;;  %734 = vst [vmem:[#allocation2 + $0x8] sm:$0xc] %v729_v16 }
 0x2d4   : > { %809 = vst [vmem:[#allocation2 + $0x18] sm:$0x30] %v804_v17 }
 0x2d5   : > { %v787_v18 = vpop.permute.xlu1 %786  ;;  %v744_v19 = vpop.permute.xlu0 %743 }
 0x2d6   : > { %v790_v20 = vsel %vm401_vm7, %v785_v5, %v787_v18  ;;  %v791_v21 = vsel %vm401_vm7, %v787_v18, %v789_v55  ;;  %v746_v22 = vsel %vm356_vm2, %v742_v52, %v744_v19  ;;  %753 = vst.msk [vmem:[#allocation2 + $0x10] sm:$0x30] %vm752_vm0, %v744_v19  ;;  %v1022_v55 = vrot.slane %v1013_v47, %v646_v13 }
 0x2d7   : > { %795 = vst [vmem:[#allocation2 + $0x18] sm:$0xc] %v790_v20  ;;  %796 = vst [vmem:[#allocation2 + $0x20] sm:$0xc] %v791_v21 }
 0x2d8   : > { %751 = vst [vmem:[#allocation2 + $0x8] sm:$0x30] %v746_v22 }
 0x2d9   : > { %v756_v23 = vpop.permute.xlu1 %755  ;;  %v803_v24 = vpop.permute.xlu0 %802 }
 0x2da   : > { %v761_v25 = vsel %vm371_vm5, %v756_v23, %v758_v56  ;;  %v805_v26 = vsel %vm416_vm8, %v801_v54, %v803_v24  ;;  %811 = vst.msk [vmem:[#allocation2 + $0x28] sm:$0x30] %vm752_vm0, %v803_v24  ;;  %vm1050_vm0 = vcmask 412672  }
 0x2db   : > { %766 = vst [vmem:[#allocation2] sm:$0xc0] %v761_v25  ;;  %810 = vst [vmem:[#allocation2 + $0x20] sm:$0x30] %v805_v26 }
 0x2dd   : > { %v813_v27 = vpop.permute.xlu1 %812  ;;  %v829_v28 = vpop.permute.xlu0 %828  ;;  %v843_v32 = vld [vmem:[#allocation2 + $0x10] sm:$0xff] }
 0x2de   : > { %v818_v29 = vsel %vm431_vm9, %v813_v27, %v815_v62 }
 0x2df   : > { %823 = vst [vmem:[#allocation2 + $0x18] sm:$0xc0] %v818_v29  ;;  %v842_v37 = vld [vmem:[#allocation2 + $0x8] sm:$0xff] }
 0x2e1   : > { %v831_v30 = vpop.permute.xlu1 %830  ;;  %v827_v31 = vpop.permute.xlu0 %826  ;;  %v846_v33 = vld [vmem:[#allocation2 + $0x28] sm:$0xff] }
 0x2e2   : > { %v833_v34 = vsel %vm446_vm10, %v829_v28, %v831_v30  ;;  %839 = vst.msk [vmem:[#allocation2 + $0x40] sm:$0x3] %vm711_vm1, %v831_v30  ;;  %v832_v35 = vsel %vm446_vm10, %v827_v31, %v829_v28  ;;  %v1535_v36 = vpack.c.bf16 %v846_v33, %v843_v32  ;;  %v845_v38 = vld [vmem:[#allocation2 + $0x20] sm:$0xff]  ;;  %vm856_vm1 = vcmask 146432  }
 0x2e3   : > { %838 = vst [vmem:[#allocation2 + $0x38] sm:$0x3] %v833_v34  ;;  %837 = vst [vmem:[#allocation2 + $0x30] sm:$0x3] %v832_v35  ;;  %v1530_v39 = vpack.c.bf16 %v845_v38, %v842_v37  ;;  %v841_v40 = vld [vmem:[#allocation2] sm:$0xff] }
 0x2e4   : > { %1536 = vmatpush3.bf16.msra.mxu1 %v1535_v36 }
 0x2e5   : > { %1531 = vmatprep.subr.bf16.mxu0 %v1530_v39  ;;  %1498 = vmatprep.subr.mxu1 %v1726_v6 }
 0x2e6   : > { %v844_v41 = vld [vmem:[#allocation2 + $0x18] sm:$0xff] }
 0x2e7   : > { %v1532_v42 = vpack.c.bf16 %v844_v41, %v841_v40 }
 0x2e9   : > { %1533 = vmatpush1.bf16.msra.mxu0 %v1532_v42  ;;  %v849_v44 = vld [vmem:[#allocation2 + $0x40] sm:$0x3] }
 0x2ea   : > { %1499 = vmatpush3.msk.msra.mxu1 %vm632_vm13, %v849_v44  ;;  %v848_v45 = vld [vmem:[#allocation2 + $0x38] sm:$0x3]  ;;  %v847_v46 = vld [vmem:[#allocation2 + $0x30] sm:$0x3] }
 0x2eb   : > { %1452 = vmatprep.subr.msk.mxu0 %vm632_vm13, %v848_v45  ;;  %1501 = vmatmul.mubr.msk.f32.vlgmr.msra.gmra.mrb[2].mxu1 %vm856_vm1, %v840_v43 }
 0x2ec   : > { %1545 = vmatprep.subr.bf16.mxu1 %v1721_v4  ;;  %1513 = vmatprep.mubr.msk.f32.mxu1 %vm2187_vm4, %v1726_v6 }
 0x2ed   : > { %1453 = vmatpush1.msk.msra.mxu0 %vm632_vm13, %v847_v46  ;;  %vm1046_vm13 = vcmask 1043608  }
 0x2ee   : > { %1454 = vmatmul.mubr.msk.f32.vlgmr.msra.gmra.mrb[2].mxu0 %vm856_vm1, %v840_v43  ;;  %vm1048_vm14 = vmor %vm1047_vm11, %vm1046_vm13  ;;  %vm2188_vm1 = vcmask 257024   ;;  %vm2192_vm13 = vcmask 261124  }
 0x2ef   : > { %1273 = vmatprep.mubr.f32.mxu0 %v1726_v6  ;;  %vm2190_vm4 = vmmov %vm2188_vm1 }
 0x2f0   : > { %vm2191_vm15 = vmmov %vm2188_vm1 }
 0x2f2   : > { %v854_v48 = vpop.permute.xlu1 %853 }
 0x3be   : > { %v1006_v50 = vpop.f32.mrb[2].mxu1 }
 0x3bf   : > { %v1007_v51 = vadd.f32 %v1006_v50, %v854_v48  ;;  %v1502_v52 = vpop.f32.mrb[3].mxu1 }
 0x3c1   : > { %v935_v54 = vpop.f32.mrb[2].mxu0  ;;  %v1032_v56 = vmul.f32 %v1026_v49, %v1007_v51 }
 0x3c2   : > { %v936_v57 = vadd.f32 %v935_v54, %v854_v48  ;;  %v937_v58 = vpop.f32.mrb[3].mxu0 }
 0x3c3   : > { %v938_v59 = vadd.f32 %v937_v58, %v854_v48  ;;  %1039 = vrot.lane.b32.xlu1 %v1032_v56, %s1731_s19 }
 0x3c4   : > { %v1030_v60 = vmul.f32 %v1018_v53, %v936_v57 }
 0x3c5   : > { %v1031_v61 = vmul.f32 %v1022_v55, %v938_v59 }
 0x3c7   : > { %v1036_v62 = vcombine.low %v1030_v60, %v1031_v61 }
 0x3c9   : > { %1037 = vrot.lane.b32.xlu0 %v1036_v62, %s1731_s19 }
 0x435   : > { %v1040_v63 = vpop.permute.xlu1 %1039 }
 0x43b   : > { %v1038_v14 = vpop.permute.xlu0 %1037 }
 0x43c   : > { %v1041_v11 = vrot.slane %v1038_v14, 4 }
 0x43e   : > { %v1042_v10 = vsel %vm680_vm12, %v1041_v11, %v1038_v14  ;;  %v1043_v13 = vsel %vm680_vm12, %v1041_v11, %v1040_v63  ;;  %vm2189_vm12 = vmmov %vm2188_vm1 }
 0x43f   : > { %1049 = vst.msk [vmem:[#allocation4] sm:$0xff] %vm1048_vm14, %v1042_v10  ;;  %vm2202_vm14 = vmmov %vm2188_vm1 }
 0x440   : > { %1051 = vst.msk [vmem:[#allocation4 + $0x8] sm:$0xf] %vm1050_vm0, %v1043_v13 }
 0x446   : > { %v1052_v0 = vld [vmem:[#allocation4] sm:$0xff] }
 0x447   : > { %v1053_v1 = vld [vmem:[#allocation4 + $0x8] sm:$0xf]  ;;  %1065 = vrot.lane.b32.xlu0 %v1052_v0, %s1719_s26  ;;  %1058 = vst [vmem:[#allocation2] sm:$0xf] %v1052_v0  ;;  %v1056_v2 = vcombine.high %v1052_v0, %v1052_v0  ;;  %v1061_v3 = vcombine.low %v1052_v0, %v1052_v0 }
 0x448   : > { %1081 = vrot.lane.b32.xlu1 %v1053_v1, %s1718_s23  ;;  %1060 = vst.msk [vmem:[#allocation2 + $0x10] sm:$0xf] %vm2188_vm1, %v1053_v1  ;;  %v1062_v5 = vcombine.low %v1053_v1, %v1053_v1 }
 0x449   : > { %1059 = vst [vmem:[#allocation2 + $0x8] sm:$0xf] %v1056_v2 }
 0x44b   : > { %1093 = vrot.lane.b32.xlu0 %v1052_v0, %s1720_s10 }
 0x44c   : > { %1077 = vrot.lane.b32.xlu1 %v1052_v0, %s1718_s23 }
 0x44f   : > { %1109 = vrot.lane.b32.xlu0 %v1053_v1, %s1722_s15 }
 0x450   : > { %1121 = vrot.lane.b32.xlu1 %v1052_v0, %s1723_s21 }
 0x453   : > { %1137 = vrot.lane.b32.xlu0 %v1053_v1, %s1724_s22 }
 0x454   : > { %1149 = vrot.lane.b32.xlu1 %v1052_v0, %s1725_s18 }
 0x457   : > { %1079 = vrot.lane.b32.xlu0 %v1056_v2, %s1718_s23 }
 0x458   : > { %1105 = vrot.lane.b32.xlu1 %v1052_v0, %s1722_s15 }
 0x45b   : > { %1063 = vrot.lane.b32.xlu0 %v1061_v3, %s1719_s26 }
 0x45c   : > { %1133 = vrot.lane.b32.xlu1 %v1052_v0, %s1724_s22 }
 0x45f   : > { %1091 = vrot.lane.b32.xlu0 %v1061_v3, %s1720_s10 }
 0x460   : > { %1067 = vrot.lane.b32.xlu1 %v1062_v5, %s1719_s26 }
 0x463   : > { %1123 = vrot.lane.b32.xlu0 %v1062_v5, %s1723_s21 }
 0x464   : > { %1095 = vrot.lane.b32.xlu1 %v1062_v5, %s1720_s10 }
 0x467   : > { %1151 = vrot.lane.b32.xlu0 %v1062_v5, %s1725_s18 }
 0x468   : > { %1107 = vrot.lane.b32.xlu1 %v1056_v2, %s1722_s15 }
 0x46b   : > { %1119 = vrot.lane.b32.xlu0 %v1061_v3, %s1723_s21  ;;  %s321_s21 = scalar_lea.vmem [#allocation8], %s1553_s13  ;;  %s1357_s13 = scalar_lea.sflag [#allocation7], %s1877_s12 }
 0x46c   : > { %1135 = vrot.lane.b32.xlu1 %v1056_v2, %s1724_s22  ;;  %s1554_s22 = smul.u32 192, %s1799_s9  ;;  %s1732_s9 = smov [#allocation8]  }
 0x46d   : > { %s1653_s14 = sshll.u32 %s1732_s9, 4  ;;  %s1654_s14 = int_to_ptr.vmem [resolvable:$false] %s1653_s14 }
 0x46e   : > { %s2121_s24 = scalar_lea.hbm %s2173_s8, %s1554_s22  ;;  %s1655_s23 = scalar_lea.vmem %s1654_s14, 384 }
 0x46f   : > { %1147 = vrot.lane.b32.xlu0 %v1061_v3, %s1725_s18  ;;  %s1371_s18 = sshll.u32 %s321_s21, 4  ;;  %s2123_s18 = int_to_ptr.vmem [resolvable:$true] %s1371_s18 }
 0x470   : > { %1163 = vrot.lane.b32.xlu1 %v1056_v2, %s1727_s20  ;;  %s1649_s25 = scalar_lea.vmem %s2123_s18, 192  ;;  %p1656_p5 = scmp.lt.s32.totalorder %s2123_s18, %s1654_s14 }
 0x471   : > { %p1650_p6 = scmp.ne.s32.totalorder %s2123_s18, %s1649_s25  ;;  %p1657_p10 = scmp.lt.s32.totalorder %s1655_s23, %s1649_s25 }
 0x473   : > { %1165 = vrot.lane.b32.xlu0 %v1053_v1, %s1727_s20  ;;  %p1651_p12 = pnand %p1650_p6, %p2203_p11  ;;  %p1658_p2 = por %p1657_p10, %p1656_p5 }
 0x474   : > { %1161 = vrot.lane.b32.xlu1 %v1052_v0, %s1727_s20 }
 0x475   : > { %p1652_p13 = pneg %p1651_p12 }
 0x477   : > { %1194 = vperm.xlu0 %1615, %v1191_v7   ;;  %p1659_p4 = pnand %p1658_p2, %p1652_p13 }
 0x4b9   : > { %v1066_v8 = vpop.permute.xlu0 %1065 }
 0x4ba   : > { %v1082_v9 = vpop.permute.xlu1 %1081 }
 0x4bb   : > { %1090 = vst.msk [vmem:[#allocation2 + $0x28] sm:$0xf] %vm2189_vm12, %v1082_v9 }
 0x4bd   : > { %v1094_v12 = vpop.permute.xlu0 %1093 }
 0x4be   : > { %v1078_v15 = vpop.permute.xlu1 %1077 }
 0x4c1   : > { %v1110_v16 = vpop.permute.xlu0 %1109 }
 0x4c2   : > { %v1122_v17 = vpop.permute.xlu1 %1121  ;;  %1118 = vst.msk [vmem:[#allocation2 + $0x40] sm:$0xf] %vm2190_vm4, %v1110_v16 }
 0x4c5   : > { %v1138_v18 = vpop.permute.xlu0 %1137 }
 0x4c6   : > { %v1150_v19 = vpop.permute.xlu1 %1149  ;;  %1146 = vst.msk [vmem:[#allocation2 + $0x58] sm:$0xf] %vm2191_vm15, %v1138_v18 }
 0x4c9   : > { %v1080_v20 = vpop.permute.xlu0 %1079 }
 0x4ca   : > { %v1106_v21 = vpop.permute.xlu1 %1105  ;;  %v1083_v22 = vsel %vm356_vm2, %v1078_v15, %v1080_v20  ;;  %v1084_v23 = vsel %vm356_vm2, %v1080_v20, %v1082_v9  ;;  %vm2193_vm2 = vmmov %vm2192_vm13 }
 0x4cb   : > { %1088 = vst [vmem:[#allocation2 + $0x18] sm:$0xf] %v1083_v22  ;;  %1089 = vst [vmem:[#allocation2 + $0x20] sm:$0xf] %v1084_v23 }
 0x4cc   : > { %vm2194_vm11 = vmmov %vm2193_vm2 }
 0x4cd   : > { %v1064_v24 = vpop.permute.xlu0 %1063 }
 0x4ce   : > { %v1134_v25 = vpop.permute.xlu1 %1133  ;;  %v1069_v26 = vsel %vm340_vm3, %v1064_v24, %v1066_v8 }
 0x4cf   : > { %1074 = vst [vmem:[#allocation2] sm:$0xf0] %v1069_v26 }
 0x4d1   : > { %v1092_v27 = vpop.permute.xlu0 %1091 }
 0x4d2   : > { %v1068_v28 = vpop.permute.xlu1 %1067  ;;  %v1097_v29 = vsel %vm371_vm5, %v1092_v27, %v1094_v12 }
 0x4d3   : > { %v1070_v30 = vsel %vm340_vm3, %v1066_v8, %v1068_v28  ;;  %1076 = vst.msk [vmem:[#allocation2 + $0x10] sm:$0xf0] %vm2192_vm13, %v1068_v28  ;;  %1102 = vst [vmem:[#allocation2 + $0x18] sm:$0xf0] %v1097_v29 }
 0x4d4   : > { %1075 = vst [vmem:[#allocation2 + $0x8] sm:$0xf0] %v1070_v30  ;;  %vm2195_vm3 = vmmov %vm2193_vm2 }
 0x4d5   : > { %v1124_v31 = vpop.permute.xlu0 %1123 }
 0x4d6   : > { %v1096_v32 = vpop.permute.xlu1 %1095  ;;  %v1126_v33 = vsel %vm401_vm7, %v1122_v17, %v1124_v31  ;;  %1132 = vst.msk [vmem:[#allocation2 + $0x40] sm:$0xf0] %vm2193_vm2, %v1124_v31  ;;  %v1176_v52 = vld [vmem:[#allocation2] sm:$0xff] }
 0x4d7   : > { %v1098_v34 = vsel %vm371_vm5, %v1094_v12, %v1096_v32  ;;  %1104 = vst.msk [vmem:[#allocation2 + $0x28] sm:$0xf0] %vm2194_vm11, %v1096_v32  ;;  %1131 = vst [vmem:[#allocation2 + $0x38] sm:$0xf0] %v1126_v33 }
 0x4d8   : > { %1103 = vst [vmem:[#allocation2 + $0x20] sm:$0xf0] %v1098_v34  ;;  %vm2196_vm5 = vmmov %vm2188_vm1 }
 0x4d9   : > { %v1152_v35 = vpop.permute.xlu0 %1151 }
 0x4da   : > { %v1108_v36 = vpop.permute.xlu1 %1107  ;;  %v1154_v37 = vsel %vm431_vm9, %v1150_v19, %v1152_v35  ;;  %1160 = vst.msk [vmem:[#allocation2 + $0x58] sm:$0xf0] %vm2195_vm3, %v1152_v35  ;;  %v1178_v42 = vld [vmem:[#allocation2 + $0x10] sm:$0xff]  ;;  %v1179_v44 = vld [vmem:[#allocation2 + $0x18] sm:$0xff] }
 0x4db   : > { %v1111_v38 = vsel %vm386_vm6, %v1106_v21, %v1108_v36  ;;  %v1112_v39 = vsel %vm386_vm6, %v1108_v36, %v1110_v16  ;;  %1159 = vst [vmem:[#allocation2 + $0x50] sm:$0xf0] %v1154_v37  ;;  %v1177_v49 = vld [vmem:[#allocation2 + $0x8] sm:$0xff]  ;;  %v1539_v53 = vpack.c.bf16 %v1179_v44, %v1176_v52  ;;  %vm2197_vm6 = vcmask 1043456  }
 0x4dc   : > { %1116 = vst [vmem:[#allocation2 + $0x30] sm:$0xf] %v1111_v38  ;;  %1117 = vst [vmem:[#allocation2 + $0x38] sm:$0xf] %v1112_v39 }
 0x4dd   : > { %v1120_v40 = vpop.permute.xlu0 %1119  ;;  %v1184_v56 = vld [vmem:[#allocation2 + $0x40] sm:$0xff] }
 0x4de   : > { %v1136_v41 = vpop.permute.xlu1 %1135  ;;  %v1181_v43 = vld [vmem:[#allocation2 + $0x28] sm:$0xff]  ;;  %v1125_v45 = vsel %vm401_vm7, %v1120_v40, %v1122_v17  ;;  %vm2198_vm7 = vmmov %vm2197_vm6 }
 0x4df   : > { %v1139_v46 = vsel %vm416_vm8, %v1134_v25, %v1136_v41  ;;  %v1140_v47 = vsel %vm416_vm8, %v1136_v41, %v1138_v18  ;;  %v1546_v48 = vpack.c.bf16 %v1181_v43, %v1178_v42  ;;  %v1180_v50 = vld [vmem:[#allocation2 + $0x20] sm:$0xff]  ;;  %1130 = vst [vmem:[#allocation2 + $0x30] sm:$0xf0] %v1125_v45  ;;  %vm2199_vm8 = vcmask 293888  }
 0x4e0   : > { %1144 = vst [vmem:[#allocation2 + $0x48] sm:$0xf] %v1139_v46  ;;  %1145 = vst [vmem:[#allocation2 + $0x50] sm:$0xf] %v1140_v47  ;;  %v1537_v51 = vpack.c.bf16 %v1180_v50, %v1177_v49 }
 0x4e1   : > { %1547 = vmatpush3.bf16.msra.mxu1 %v1546_v48  ;;  %v1148_v54 = vpop.permute.xlu0 %1147  ;;  %v1187_v57 = vld [vmem:[#allocation2 + $0x58] sm:$0xff] }
 0x4e2   : > { %1538 = vmatprep.subr.bf16.mxu0 %v1537_v51  ;;  %v1164_v55 = vpop.permute.xlu1 %1163  ;;  %1548 = vmatprep.subr.bf16.mxu1 %v1721_v4  ;;  %v1153_v58 = vsel %vm431_vm9, %v1148_v54, %v1150_v19  ;;  %v1549_v59 = vpack.c.bf16 %v1187_v57, %v1184_v56  ;;  %vm2200_vm9 = vmmov %vm2197_vm6 }
 0x4e3   : > { %1540 = vmatpush1.bf16.msra.mxu0 %v1539_v53  ;;  %1158 = vst [vmem:[#allocation2 + $0x48] sm:$0xf0] %v1153_v58  ;;  %v1183_v11 = vld [vmem:[#allocation2 + $0x38] sm:$0xff] }
 0x4e5   : > { %1550 = vmatpush3.bf16.msra.mxu1 %v1549_v59  ;;  %v1166_v60 = vpop.permute.xlu0 %1165 }
 0x4e6   : > { %v1162_v61 = vpop.permute.xlu1 %1161  ;;  %1511 = vmatprep.subr.mxu1 %v1726_v6  ;;  %v1168_v62 = vsel %vm446_vm10, %v1164_v55, %v1166_v60  ;;  %1174 = vst.msk [vmem:[#allocation2 + $0x70] sm:$0xf] %vm2196_vm5, %v1166_v60  ;;  %v1182_v10 = vld [vmem:[#allocation2 + $0x30] sm:$0xff]  ;;  %v1175_v6 = vld [vmem:[%s2170_s5] sm:$0xf] }
 0x4e7   : > { %v1167_v14 = vsel %vm446_vm10, %v1162_v61, %v1164_v55  ;;  %v1186_v4 = vld [vmem:[#allocation2 + $0x50] sm:$0xff]  ;;  %1173 = vst [vmem:[#allocation2 + $0x68] sm:$0xf] %v1168_v62  ;;  %vm2201_vm10 = vmmov %vm2199_vm8 }
 0x4e8   : > { %1172 = vst [vmem:[#allocation2 + $0x60] sm:$0xf] %v1167_v14  ;;  %v1541_v63 = vpack.c.bf16 %v1186_v4, %v1183_v11 }
 0x4ea   : > { %1542 = vmatprep.subr.bf16.mxu0 %v1541_v63  ;;  %v1185_v13 = vld [vmem:[#allocation2 + $0x48] sm:$0xff] }
 0x4eb   : > { %v1543_v0 = vpack.c.bf16 %v1185_v13, %v1182_v10 }
 0x4ed   : > { %1544 = vmatpush1.bf16.msra.mxu0 %v1543_v0  ;;  %v1190_v1 = vld [vmem:[#allocation2 + $0x70] sm:$0xf] }
 0x4ee   : > { %1512 = vmatpush3.msk.msra.mxu1 %vm2197_vm6, %v1190_v1  ;;  %v1189_v2 = vld [vmem:[#allocation2 + $0x68] sm:$0xf] }
 0x4ef   : > { %1457 = vmatprep.subr.msk.mxu0 %vm2198_vm7, %v1189_v2  ;;  %1514 = vmatmul.mubr.msk.f32.vlgmr.msra.gmra.mrb[4].mxu1 %vm2199_vm8, %v1175_v6  ;;  %v1188_v3 = vld [vmem:[#allocation2 + $0x60] sm:$0xf] }
 0x4f1   : > { %1458 = vmatpush1.msk.msra.mxu0 %vm2200_vm9, %v1188_v3 }
 0x4f2   : > { %1459 = vmatmul.mubr.msk.f32.vlgmr.msra.gmra.mrb[4].mxu0 %vm2201_vm10, %v1175_v6 }
 0x4f6   : > { %v1195_v5 = vpop.permute.xlu0 %1194 }
 0x5c2   : > { %v1346_v7 = vpop.f32.mrb[4].mxu1 }
 0x5c3   : > { %v1347_v8 = vadd.f32 %v1346_v7, %v1195_v5  ;;  %v1515_v9 = vpop.f32.mrb[5].mxu1 }
 0x5c5   : > { %v1275_v12 = vpop.f32.mrb[4].mxu0  ;;  %1355 = vst.msk [vmem:[%s321_s21 + $0x8] sm:$0xf] %vm2202_vm14, %v1347_v8 }
 0x5c6   : > { %v1276_v15 = vadd.f32 %v1275_v12, %v1195_v5  ;;  %v1277_v16 = vpop.f32.mrb[5].mxu0 }
 0x5c7   : > { %v1278_v17 = vadd.f32 %v1277_v16, %v1195_v5 }
 0x5c9   : > { %v1352_v18 = vcombine.low %v1276_v15, %v1278_v17 }
 0x5cb   : > { %1354 = vst [vmem:[%s321_s21] sm:$0xff] %v1352_v18 }
 0x5cc   : > { %1662 = shalt.err (!%p1659_p4)
}
 0x5cd   : > { %s1663_s12 = scalar_lea.hbm %s2121_s24, 192  ;;  %s1667_s15 = scalar_lea.hbm %s2173_s8, 384 }
 0x5ce   : > { %p1664_p7 = scmp.ne.s32.totalorder %s2121_s24, %s1663_s12  ;;  %p1668_p0 = scmp.lt.u32.totalorder %s2121_s24, %s2173_s8 }
 0x5cf   : > { %p1669_p1 = scmp.lt.u32.totalorder %s1667_s15, %s1663_s12  ;;  %p1671_p6 = scmp.lt.u32.totalorder %s1663_s12, %s2121_s24 }
 0x5d0   : > { %p1665_p8 = pnand %p1664_p7, %p2203_p11 }
 0x5d1   : > { %p1670_p3 = por %p1669_p1, %p1668_p0 }
 0x5d2   : > { %p1666_p9 = pneg %p1665_p8 }
 0x5d3   : > { %p1672_p12 = por %p1671_p6, %p1670_p3 }
 0x5d5   : > { %p1673_p13 = pnand %p1672_p12, %p1666_p9 }
 0x5d7   : > { %1676 = shalt.err (!%p1673_p13)
}
 0x5d8   : > { %1557 = dma.vmem_to_hbm [thread:$0]  (%p2203_p11), %s2123_s18, 192, %s2121_s24, %s1357_s13  }
 0x5d9 PF: > { %s1383_s20 = sand.u32 1, %s1703_s27   ;;  %p2204_p5 = scmp.ne.s32.totalorder %s2183_s17, 0 }
 0x5da   : > { %p2205_p10 = scmp.ge.s32.totalorder %s1715_s30, 2  ;;  %s1384_s19 = scalar_lea.sflag [#allocation7], %s1383_s20 }
 0x5dc   : > { %p1564_p2 = pnand %p2205_p10, %p2204_p5 }
 0x5de   : > { %1698 = dma.done.wait (!%p1564_p2), %s1384_s19, 192  }
 0x5df   : > { %1700 = vsyncadd (!%p1564_p2), %s1384_s19, 4294967104  ;;  %s2206_s25 = sld [smem:[#allocation11_spill]]  ;;  %p21_p4 = scmp.ge.s32.totalorder %s1803_s11, 4  }
 0x5e0   : > { %s2207_s27 = smov %s1707_s28  ;;  %s2208_s28 = smov %s1711_s29 }
 0x5e1   : > { %s2210_s30 = smov %s1803_s11  ;;  %23 = sbr.rel (!%p21_p4) target bundleno = 5 (0x5), region = 97 }
 0x5e5   : > { %s2209_s29 = smov %s2206_s25 }
 0x5e8   :  { %1389 = vsyncpa [#allocation6], 1 }
 0x5e9   :  { %1391 = vsyncpa [#allocation6 + $0x1], 1 }
 0x5ea   :  { %1392 = vsyncpa [#allocation7], 1 }
 0x5eb   :  { %1394 = vsyncpa [#allocation7 + $0x1], 1 }

</bundles_post_ra>
